<compile_context>
chip_gen: v5e
topology: v5e:2x2
jax: 0.10.0
libtpu: 0.0.40
codegen_flags: <defaults>
</compile_context>

<pallas_src>
import jax
import jax.numpy as jnp
from jax.experimental import pallas as pl
from jax.experimental.pallas import tpu as pltpu

EPS = 1e-5
_SHIFTS_3x3 = tuple((kh, kw) for kh in range(3) for kw in range(3))


def _round_up(x: int, m: int) -> int:
    return (x + m - 1) // m * m


def _vmem_limit_bytes() -> int:
    # Derive the scoped-VMEM budget per generation (leave headroom below physical capacity).
    try:
        cap = int(pltpu.get_tpu_info().vmem_capacity_bytes)
    except Exception:
        cap = 64 << 20          # conservative fallback (v7x physical VMEM per TensorCore)
    return min((cap * 3) // 4, 96 << 20)


# ---------------------------------------------------------------------------
# In-kernel helpers
# ---------------------------------------------------------------------------
def _sublane_partials(y):
    """(M, C) -> (8, C) per-sublane partial column sums (no cross-sublane XLU reduce in-kernel);
    the final 8->1 and over-images reductions happen in the wrapper."""
    m, c = y.shape
    if m % 8 == 0:
        return y.reshape(m // 8, 8, c).sum(axis=0)
    s = jnp.sum(y, axis=0, keepdims=True)
    return jnp.concatenate([s, jnp.zeros((7, c), s.dtype)], axis=0)


# ---------------------------------------------------------------------------
# Pallas kernels
# ---------------------------------------------------------------------------
def make_conv_shortcut_kernel(shifts, t_sc, ho, wo, cp):
    """conv1 streamed as len(shifts) accumulating MXU dots over shifted views of one padded image,
    with the 1x1 shortcut conv fused as one extra dot on tap `t_sc`, plus per-image BN partial
    statistics from the f32 accumulators (two-pass BN, pass 1)."""
    m = ho * wo

    def kernel(x_ref, wt_ref, wsc_ref, y_ref, st_ref):
        kc = x_ref.shape[-1]
        acc = jnp.zeros((m, cp), jnp.float32)
        acc_sc = None
        for t, (dh, dw) in enumerate(shifts):
            xt = x_ref[dh:dh + ho, dw:dw + wo, :].reshape(m, kc)
            acc = acc + jnp.dot(xt, wt_ref[t], preferred_element_type=jnp.float32)
            if t == t_sc:                      # shortcut 1x1 conv reads exactly this tap
                acc_sc = jnp.dot(xt, wsc_ref[...], preferred_element_type=jnp.float32)
        # single lane-dense store: [conv1 | shortcut] along channels (bf16 when store dtype is bf16)
        y_ref[...] = jnp.concatenate(
            [acc.reshape(ho, wo, cp), acc_sc.reshape(ho, wo, cp)], axis=-1
        ).astype(y_ref.dtype)
        # per-image, per-sublane BN partial statistics (reduced in the wrapper -> grid stays parallel)
        st_ref[...] = jnp.stack(
            [jnp.concatenate([_sublane_partials(acc), _sublane_partials(acc_sc)], axis=-1),
             jnp.concatenate([_sublane_partials(acc * acc),
                              _sublane_partials(acc_sc * acc_sc)], axis=-1)],
            axis=0)

    return kernel


def make_conv2_kernel(ho, wo, cp):
    """conv2 (3x3 stride 1) with a fused BN1-apply + ReLU + spatial zero-pad prologue (all in VMEM,
    no h1 HBM round trip), streamed as 9 accumulating MXU dots, plus per-image BN2 partial stats."""
    m = ho * wo

    def kernel(y1_ref, sc1_ref, sh1_ref, w2_ref, c2_ref, st_ref, hpad_ref):
        # two-pass BN, pass 2 for BN1: per-channel affine + ReLU on the conv1 output tile
        h = jnp.maximum(y1_ref[...].astype(jnp.float32) * sc1_ref[...] + sh1_ref[...], 0.0)
        hpad_ref[...] = jnp.zeros_like(hpad_ref)
        hpad_ref[1:ho + 1, 1:wo + 1, :] = h.astype(hpad_ref.dtype)
        acc = jnp.zeros((m, cp), jnp.float32)
        for t, (dh, dw) in enumerate(_SHIFTS_3x3):
            xt = hpad_ref[dh:dh + ho, dw:dw + wo, :].reshape(m, cp)
            acc = acc + jnp.dot(xt, w2_ref[t], preferred_element_type=jnp.float32)
        c2_ref[...] = acc.reshape(ho, wo, cp).astype(c2_ref.dtype)
        st_ref[...] = jnp.stack([_sublane_partials(acc), _sublane_partials(acc * acc)], axis=0)

    return kernel


def final_fuse_kernel(c2_ref, ysc_ref, s2_ref, b2_ref, ss_ref, bs_ref, o_ref):
    # out = relu( relu(BN2(conv2)) + BN_s(shortcut) ); both BN applies are per-channel affines.
    main = jnp.maximum(c2_ref[...].astype(jnp.float32) * s2_ref[...] + b2_ref[...], 0.0)
    sc = ysc_ref[...].astype(jnp.float32) * ss_ref[...] + bs_ref[...]
    o_ref[...] = jnp.maximum(main + sc, 0.0).astype(o_ref.dtype)


# ---------------------------------------------------------------------------
# Wrapper-side math
# ---------------------------------------------------------------------------
def _bn_scale_shift(s, q, count, gamma, beta):
    mean = s / count
    var = jnp.maximum(q / count - mean * mean, 0.0)   # biased variance (training-mode BN)
    scale = gamma * jax.lax.rsqrt(var + EPS)
    shift = beta - mean * scale
    return scale, shift


def resnet_block_forward(x_nchw, params, downsample, *, mxu_dtype=jnp.float32, store_dtype=None):
    """Forward pass of the ResNetBlock. `store_dtype` is the dtype of the HBM intermediates
    (y_cat / c2); defaults to mxu_dtype (use bf16 for the throughput configuration)."""
    if store_dtype is None:
        store_dtype = mxu_dtype
    x = jnp.transpose(x_nchw, (0, 2, 3, 1)).astype(jnp.float32)          # NHWC
    n, h, w, cin = x.shape
    cout = params["w1"].shape[-1]
    cp = _round_up(cout, 128)        # lane-dense output channels
    cinp = _round_up(cin, 128)       # lane-dense input channels
    vmem_limit = _vmem_limit_bytes()

    if downsample:
        # stride-2 3x3 conv == stride-1 2x2 conv over a space-to-depth phase packing (a 1x
        # reshuffle, NOT a 9x im2col): xin[n,i,j,(2*pr+pc)*cinp + c] = xpad[n, 2i+pr, 2j+pc, c].
        ho, wo = (h - 1) // 2 + 1, (w - 1) // 2 + 1
        hph, wph = (h + 3) // 2, (w + 3) // 2                             # ceil((H+2)/2) >= ho+1
        xe = jnp.zeros((n, 2 * hph, 2 * wph, cinp), jnp.float32)
        xe = xe.at[:, 1:h + 1, 1:w + 1, :cin].set(x)                      # pad=1 + channel pad
        xin = xe.reshape(n, hph, 2, wph, 2, cinp).transpose(0, 1, 3, 2, 4, 5)
        xin = xin.reshape(n, hph, wph, 4 * cinp)
        kc = 4 * cinp
        shifts = tuple((a, b) for a in range(2) for b in range(2))
        wt = jnp.zeros((4, kc, cp), jnp.float32)
        for a in range(2):
            for b in range(2):
                for pr in range(2):
                    for pc in range(2):
                        kh, kw = 2 * a + pr, 2 * b + pc
                        if kh < 3 and kw < 3:
                            p = 2 * pr + pc
                            wt = wt.at[2 * a + b, p * cinp:p * cinp + cin, :cout].set(
                                params["w1"][kh, kw])
        # shortcut 1x1 stride-2 (no pad): x[2ho,2wo] = xpad[2ho+1,2wo+1] = phase (1,1) of tap (0,0)
        t_sc = 0
        wsc = jnp.zeros((kc, cp), jnp.float32).at[3 * cinp:3 * cinp + cin, :cout].set(
            params["ws"].reshape(cin, cout))
    else:
        ho, wo = h, w
        xin = jnp.zeros((n, h + 2, w + 2, cinp), jnp.float32).at[:, 1:h + 1, 1:w + 1, :cin].set(x)
        kc = cinp
        shifts = _SHIFTS_3x3
        wt = jnp.zeros((9, kc, cp), jnp.float32).at[:, :cin, :cout].set(
            params["w1"].reshape(9, cin, cout))
        t_sc = 4                                                          # center tap (1,1)
        wsc = jnp.zeros((kc, cp), jnp.float32).at[:cin, :cout].set(params["ws"].reshape(cin, cout))

    xin = xin.astype(mxu_dtype)
    wt = wt.astype(mxu_dtype)
    wsc = wsc.astype(mxu_dtype)
    hin, win = xin.shape[1], xin.shape[2]

    # ---- conv1 + fused 1x1 shortcut + BN partial stats (streamed taps, parallel over N) --------
    y_cat, st1 = pl.pallas_call(
        make_conv_shortcut_kernel(shifts, t_sc, ho, wo, cp),
        out_shape=(jax.ShapeDtypeStruct((n, ho, wo, 2 * cp), store_dtype),
                   jax.ShapeDtypeStruct((n, 2, 8, 2 * cp), jnp.float32)),
        grid=(n,),
        in_specs=[pl.BlockSpec((None, hin, win, kc), lambda i: (i, 0, 0, 0)),
                  pl.BlockSpec((len(shifts), kc, cp), lambda i: (0, 0, 0)),
                  pl.BlockSpec((kc, cp), lambda i: (0, 0))],
        out_specs=(pl.BlockSpec((None, ho, wo, 2 * cp), lambda i: (i, 0, 0, 0)),
                   pl.BlockSpec((None, 2, 8, 2 * cp), lambda i: (i, 0, 0, 0))),
        compiler_params=pltpu.CompilerParams(dimension_semantics=("parallel",),
                                             vmem_limit_bytes=vmem_limit),
    )(xin, wt, wsc)

    count = float(n * ho * wo)
    sums1 = jnp.sum(st1, axis=(0, 2))                   # (2, 2*cp): [sum ; sum of squares]

    def pad_c(v):
        return jnp.zeros((cp,), jnp.float32).at[:cout].set(v.astype(jnp.float32))

    scale1, shift1 = _bn_scale_shift(sums1[0, :cp], sums1[1, :cp], count,
                                     pad_c(params["g1"]), pad_c(params["beta1"]))
    scale_s, shift_s = _bn_scale_shift(sums1[0, cp:], sums1[1, cp:], count,
                                       pad_c(params["gs"]), pad_c(params["betas"]))

    # ---- conv2 with fused BN1+ReLU prologue (reads column-block 0 of y_cat in place) -----------
    w2t = jnp.zeros((9, cp, cp), jnp.float32).at[:, :cout, :cout].set(
        params["w2"].reshape(9, cout, cout)).astype(mxu_dtype)
    c2, st2 = pl.pallas_call(
        make_conv2_kernel(ho, wo, cp),
        out_shape=(jax.ShapeDtypeStruct((n, ho, wo, cp), store_dtype),
                   jax.ShapeDtypeStruct((n, 2, 8, cp), jnp.float32)),
        grid=(n,),
        in_specs=[pl.BlockSpec((None, ho, wo, cp), lambda i: (i, 0, 0, 0)),
                  pl.BlockSpec((1, cp), lambda i: (0, 0)),
                  pl.BlockSpec((1, cp), lambda i: (0, 0)),
                  pl.BlockSpec((9, cp, cp), lambda i: (0, 0, 0))],
        out_specs=(pl.BlockSpec((None, ho, wo, cp), lambda i: (i, 0, 0, 0)),
                   pl.BlockSpec((None, 2, 8, cp), lambda i: (i, 0, 0, 0))),
        scratch_shapes=[pltpu.VMEM((ho + 2, wo + 2, cp), mxu_dtype)],
        compiler_params=pltpu.CompilerParams(dimension_semantics=("parallel",),
                                             vmem_limit_bytes=vmem_limit),
    )(y_cat, scale1.reshape(1, cp), shift1.reshape(1, cp), w2t)

    sums2 = jnp.sum(st2, axis=(0, 2))
    scale2, shift2 = _bn_scale_shift(sums2[0], sums2[1], count,
                                     pad_c(params["g2"]), pad_c(params["beta2"]))

    # ---- fused epilogue: BN2-apply + ReLU + shortcut-BN-apply + residual add + ReLU ------------
    out = pl.pallas_call(
        final_fuse_kernel,
        out_shape=jax.ShapeDtypeStruct((n, ho, wo, cp), jnp.float32),
        grid=(n,),
        in_specs=[pl.BlockSpec((None, ho, wo, cp), lambda i: (i, 0, 0, 0)),
                  pl.BlockSpec((None, ho, wo, cp), lambda i: (i, 0, 0, 1)),  # shortcut col-block
                  pl.BlockSpec((1, cp), lambda i: (0, 0)),
                  pl.BlockSpec((1, cp), lambda i: (0, 0)),
                  pl.BlockSpec((1, cp), lambda i: (0, 0)),
                  pl.BlockSpec((1, cp), lambda i: (0, 0))],
        out_specs=pl.BlockSpec((None, ho, wo, cp), lambda i: (i, 0, 0, 0)),
        compiler_params=pltpu.CompilerParams(dimension_semantics=("parallel",),
                                             vmem_limit_bytes=vmem_limit),
    )(c2, y_cat, scale2.reshape(1, cp), shift2.reshape(1, cp),
      scale_s.reshape(1, cp), shift_s.reshape(1, cp))

    return jnp.transpose(out[:, :, :, :cout], (0, 3, 1, 2))              # back to NCHW


# ---------------------------------------------------------------------------
# Pure-JAX reference (the PyTorch-module spec, with conv biases kept)
# ---------------------------------------------------------------------------
def ref_forward(x_nchw, params, downsample):
    x = jnp.transpose(x_nchw, (0, 2, 3, 1)).astype(jnp.float32)
    s = 2 if downsample else 1

    def conv(inp, w, b, stride, pad):
        y = jax.lax.conv_general_dilated(
            inp, w, (stride, stride), pad, dimension_numbers=("NHWC", "HWIO", "NHWC"))
        return y + b

    def bn(inp, g, be):
        m = jnp.mean(inp, axis=(0, 1, 2), keepdims=True)
        v = jnp.mean((inp - m) ** 2, axis=(0, 1, 2), keepdims=True)
        return (inp - m) * jax.lax.rsqrt(v + EPS) * g + be

    sc = bn(conv(x, params["ws"], params["bs"], s, "VALID"), params["gs"], params["betas"])
    h = jax.nn.relu(
        bn(conv(x, params["w1"], params["b1"], s, [(1, 1), (1, 1)]), params["g1"], params["beta1"]))
    h = jax.nn.relu(
        bn(conv(h, params["w2"], params["b2"], 1, [(1, 1), (1, 1)]), params["g2"], params["beta2"]))
    return jnp.transpose(jax.nn.relu(h + sc), (0, 3, 1, 2))


# ---------------------------------------------------------------------------
if __name__ == "__main__":
    in_channels, out_channels = 4, 8
    N, H, W = 2, 16, 16

    key = jax.random.PRNGKey(0)
    keys = jax.random.split(key, 7)
    params = {
        # conv weights stored directly in HWIO (deterministic synthetic init)
        "w1": jax.random.normal(keys[0], (3, 3, in_channels, out_channels), jnp.float32) * 0.1,
        "b1": jax.random.normal(keys[1], (out_channels,), jnp.float32) * 0.1,
        "w2": jax.random.normal(keys[2], (3, 3, out_channels, out_channels), jnp.float32) * 0.1,
        "b2": jax.random.normal(keys[3], (out_channels,), jnp.float32) * 0.1,
        "ws": jax.random.normal(keys[4], (1, 1, in_channels, out_channels), jnp.float32) * 0.1,
        "bs": jax.random.normal(keys[5], (out_channels,), jnp.float32) * 0.1,
        # BatchNorm affine params at PyTorch defaults
        "g1": jnp.ones((out_channels,), jnp.float32),
        "beta1": jnp.zeros((out_channels,), jnp.float32),
        "g2": jnp.ones((out_channels,), jnp.float32),
        "beta2": jnp.zeros((out_channels,), jnp.float32),
        "gs": jnp.ones((out_channels,), jnp.float32),
        "betas": jnp.zeros((out_channels,), jnp.float32),
    }
    x = jax.random.normal(keys[6], (N, in_channels, H, W), jnp.float32)

    for downsample in (True, False):
        ho = H // 2 if downsample else H
        ref = jax.block_until_ready(ref_forward(x, params, downsample))
        assert ref.shape == (N, out_channels, ho, ho)

        # f32 operands / f32 intermediates: strict semantic check (also validates the bias-drop,
        # the phase-packed stride-2 path and the fused BN1+ReLU prologue against a reference that
        # DOES apply the conv biases).
        out_f32 = jax.block_until_ready(
            resnet_block_forward(x, params, downsample, mxu_dtype=jnp.float32))
        assert out_f32.shape == ref.shape, out_f32.shape
        assert jnp.allclose(out_f32, ref, rtol=1e-2, atol=1e-2), \
            float(jnp.max(jnp.abs(out_f32 - ref)))

        # bf16 MXU operands + bf16 HBM intermediates (f32 accumulation, f32 BN statistics):
        # the throughput configuration.
        out_bf16 = jax.block_until_ready(
            resnet_block_forward(x, params, downsample, mxu_dtype=jnp.bfloat16))
        assert out_bf16.shape == ref.shape, out_bf16.shape
        assert jnp.allclose(out_bf16, ref, rtol=5e-2, atol=5e-2), \
            float(jnp.max(jnp.abs(out_bf16 - ref)))

    print("KERNEL_OK")
</pallas_src>

<mosaic_0001>
module attributes {stable_mosaic.version = 11 : i64} {
  func.func @kernel(%arg0: i32, %arg1: memref<1x9x9x512xf32, #tpu.memory_space<vmem>>, %arg2: memref<4x512x128xf32, #tpu.memory_space<vmem>>, %arg3: memref<512x128xf32, #tpu.memory_space<vmem>>, %arg4: memref<1x8x8x256xf32, #tpu.memory_space<vmem>>, %arg5: memref<1x2x8x256xf32, #tpu.memory_space<vmem>>) attributes {dimension_semantics = [#tpu.dimension_semantics<parallel>], iteration_bounds = array<i64: 2>, scalar_prefetch = 0 : i64, scratch_operands = 0 : i64, tpu.core_type = #tpu.core_type<tc>, window_params = [{transform_indices = @transform_0, window_bounds = array<i64: 1, 9, 9, 512>}, {pipeline_mode = #tpu.pipeline_mode<synchronous>, transform_indices = @transform_1, window_bounds = array<i64: 4, 512, 128>}, {pipeline_mode = #tpu.pipeline_mode<synchronous>, transform_indices = @transform_2, window_bounds = array<i64: 512, 128>}, {transform_indices = @transform_3, window_bounds = array<i64: 1, 8, 8, 256>}, {transform_indices = @transform_4, window_bounds = array<i64: 1, 2, 8, 256>}]} {
    %cst = arith.constant 0.000000e+00 : f32
    %0 = vector.broadcast %cst : f32 to vector<64x128xf32>
    %c0 = arith.constant 0 : index
    %c0_0 = arith.constant 0 : index
    %c0_1 = arith.constant 0 : index
    %c0_2 = arith.constant 0 : index
    %1 = vector.load %arg1[%c0, %c0_0, %c0_1, %c0_2] : memref<1x9x9x512xf32, #tpu.memory_space<vmem>>, vector<1x8x8x512xf32>
    %2 = vector.shape_cast %1 : vector<1x8x8x512xf32> to vector<8x8x512xf32>
    %3 = vector.shape_cast %2 : vector<8x8x512xf32> to vector<64x512xf32>
    %c0_3 = arith.constant 0 : index
    %c0_4 = arith.constant 0 : index
    %c0_5 = arith.constant 0 : index
    %4 = vector.load %arg2[%c0_3, %c0_4, %c0_5] : memref<4x512x128xf32, #tpu.memory_space<vmem>>, vector<1x512x128xf32>
    %5 = vector.shape_cast %4 : vector<1x512x128xf32> to vector<512x128xf32>
    %cst_6 = arith.constant dense<0.000000e+00> : vector<64x128xf32>
    %6 = tpu.matmul %3, %5, %cst_6 {dimension_numbers = #tpu.dot_dimension_numbers<[1], [0], [0], [1], [0, 0, 1, 1], [], []>} : vector<64x512xf32>, vector<512x128xf32>, vector<64x128xf32> -> vector<64x128xf32>
    %7 = arith.addf %0, %6 : vector<64x128xf32>
    %c0_7 = arith.constant 0 : index
    %c0_8 = arith.constant 0 : index
    %8 = vector.load %arg3[%c0_7, %c0_8] : memref<512x128xf32, #tpu.memory_space<vmem>>, vector<512x128xf32>
    %cst_9 = arith.constant dense<0.000000e+00> : vector<64x128xf32>
    %9 = tpu.matmul %3, %8, %cst_9 {dimension_numbers = #tpu.dot_dimension_numbers<[1], [0], [0], [1], [0, 0, 1, 1], [], []>} : vector<64x512xf32>, vector<512x128xf32>, vector<64x128xf32> -> vector<64x128xf32>
    %c0_10 = arith.constant 0 : index
    %c0_11 = arith.constant 0 : index
    %c1 = arith.constant 1 : index
    %c0_12 = arith.constant 0 : index
    %10 = vector.load %arg1[%c0_10, %c0_11, %c1, %c0_12] : memref<1x9x9x512xf32, #tpu.memory_space<vmem>>, vector<1x8x8x512xf32>
    %11 = vector.shape_cast %10 : vector<1x8x8x512xf32> to vector<8x8x512xf32>
    %12 = vector.shape_cast %11 : vector<8x8x512xf32> to vector<64x512xf32>
    %c1_13 = arith.constant 1 : index
    %c0_14 = arith.constant 0 : index
    %c0_15 = arith.constant 0 : index
    %13 = vector.load %arg2[%c1_13, %c0_14, %c0_15] : memref<4x512x128xf32, #tpu.memory_space<vmem>>, vector<1x512x128xf32>
    %14 = vector.shape_cast %13 : vector<1x512x128xf32> to vector<512x128xf32>
    %cst_16 = arith.constant dense<0.000000e+00> : vector<64x128xf32>
    %15 = tpu.matmul %12, %14, %cst_16 {dimension_numbers = #tpu.dot_dimension_numbers<[1], [0], [0], [1], [0, 0, 1, 1], [], []>} : vector<64x512xf32>, vector<512x128xf32>, vector<64x128xf32> -> vector<64x128xf32>
    %16 = arith.addf %7, %15 : vector<64x128xf32>
    %c0_17 = arith.constant 0 : index
    %c1_18 = arith.constant 1 : index
    %c0_19 = arith.constant 0 : index
    %c0_20 = arith.constant 0 : index
    %17 = vector.load %arg1[%c0_17, %c1_18, %c0_19, %c0_20] : memref<1x9x9x512xf32, #tpu.memory_space<vmem>>, vector<1x8x8x512xf32>
    %18 = vector.shape_cast %17 : vector<1x8x8x512xf32> to vector<8x8x512xf32>
    %19 = vector.shape_cast %18 : vector<8x8x512xf32> to vector<64x512xf32>
    %c2 = arith.constant 2 : index
    %c0_21 = arith.constant 0 : index
    %c0_22 = arith.constant 0 : index
    %20 = vector.load %arg2[%c2, %c0_21, %c0_22] : memref<4x512x128xf32, #tpu.memory_space<vmem>>, vector<1x512x128xf32>
    %21 = vector.shape_cast %20 : vector<1x512x128xf32> to vector<512x128xf32>
    %cst_23 = arith.constant dense<0.000000e+00> : vector<64x128xf32>
    %22 = tpu.matmul %19, %21, %cst_23 {dimension_numbers = #tpu.dot_dimension_numbers<[1], [0], [0], [1], [0, 0, 1, 1], [], []>} : vector<64x512xf32>, vector<512x128xf32>, vector<64x128xf32> -> vector<64x128xf32>
    %23 = arith.addf %16, %22 : vector<64x128xf32>
    %c0_24 = arith.constant 0 : index
    %c1_25 = arith.constant 1 : index
    %c1_26 = arith.constant 1 : index
    %c0_27 = arith.constant 0 : index
    %24 = vector.load %arg1[%c0_24, %c1_25, %c1_26, %c0_27] : memref<1x9x9x512xf32, #tpu.memory_space<vmem>>, vector<1x8x8x512xf32>
    %25 = vector.shape_cast %24 : vector<1x8x8x512xf32> to vector<8x8x512xf32>
    %26 = vector.shape_cast %25 : vector<8x8x512xf32> to vector<64x512xf32>
    %c3 = arith.constant 3 : index
    %c0_28 = arith.constant 0 : index
    %c0_29 = arith.constant 0 : index
    %27 = vector.load %arg2[%c3, %c0_28, %c0_29] : memref<4x512x128xf32, #tpu.memory_space<vmem>>, vector<1x512x128xf32>
    %28 = vector.shape_cast %27 : vector<1x512x128xf32> to vector<512x128xf32>
    %cst_30 = arith.constant dense<0.000000e+00> : vector<64x128xf32>
    %29 = tpu.matmul %26, %28, %cst_30 {dimension_numbers = #tpu.dot_dimension_numbers<[1], [0], [0], [1], [0, 0, 1, 1], [], []>} : vector<64x512xf32>, vector<512x128xf32>, vector<64x128xf32> -> vector<64x128xf32>
    %30 = arith.addf %23, %29 : vector<64x128xf32>
    %31 = vector.shape_cast %30 : vector<64x128xf32> to vector<8x8x128xf32>
    %32 = vector.shape_cast %9 : vector<64x128xf32> to vector<8x8x128xf32>
    %33 = tpu.concatenate %31, %32 in 2 : vector<8x8x128xf32>, vector<8x8x128xf32> -> vector<8x8x256xf32>
    %c0_31 = arith.constant 0 : index
    %c0_32 = arith.constant 0 : index
    %c0_33 = arith.constant 0 : index
    %c0_34 = arith.constant 0 : index
    %34 = vector.load %arg4[%c0_31, %c0_32, %c0_33, %c0_34] : memref<1x8x8x256xf32, #tpu.memory_space<vmem>>, vector<1x8x8x256xf32>
    %35 = vector.shape_cast %34 : vector<1x8x8x256xf32> to vector<8x8x256xf32>
    %36 = vector.shape_cast %33 : vector<8x8x256xf32> to vector<1x8x8x256xf32>
    tpu.vector_store %arg4[%c0_31, %c0_32, %c0_33, %c0_34], %36 {strides = array<i32>} : memref<1x8x8x256xf32, #tpu.memory_space<vmem>>, vector<1x8x8x256xf32>,
    %37 = vector.shape_cast %30 : vector<64x128xf32> to vector<8x8x128xf32>
    %cst_35 = arith.constant dense<0.000000e+00> : vector<8x128xf32>
    %38 = vector.multi_reduction <add>, %37, %cst_35 [0] : vector<8x8x128xf32> to vector<8x128xf32>
    %39 = vector.shape_cast %9 : vector<64x128xf32> to vector<8x8x128xf32>
    %cst_36 = arith.constant dense<0.000000e+00> : vector<8x128xf32>
    %40 = vector.multi_reduction <add>, %39, %cst_36 [0] : vector<8x8x128xf32> to vector<8x128xf32>
    %41 = tpu.concatenate %38, %40 in 1 : vector<8x128xf32>, vector<8x128xf32> -> vector<8x256xf32>
    %42 = arith.mulf %30, %30 : vector<64x128xf32>
    %43 = vector.shape_cast %42 : vector<64x128xf32> to vector<8x8x128xf32>
    %cst_37 = arith.constant dense<0.000000e+00> : vector<8x128xf32>
    %44 = vector.multi_reduction <add>, %43, %cst_37 [0] : vector<8x8x128xf32> to vector<8x128xf32>
    %45 = arith.mulf %9, %9 : vector<64x128xf32>
    %46 = vector.shape_cast %45 : vector<64x128xf32> to vector<8x8x128xf32>
    %cst_38 = arith.constant dense<0.000000e+00> : vector<8x128xf32>
    %47 = vector.multi_reduction <add>, %46, %cst_38 [0] : vector<8x8x128xf32> to vector<8x128xf32>
    %48 = tpu.concatenate %44, %47 in 1 : vector<8x128xf32>, vector<8x128xf32> -> vector<8x256xf32>
    %49 = vector.shape_cast %41 : vector<8x256xf32> to vector<1x8x256xf32>
    %50 = vector.shape_cast %48 : vector<8x256xf32> to vector<1x8x256xf32>
    %51 = tpu.concatenate %49, %50 in 0 : vector<1x8x256xf32>, vector<1x8x256xf32> -> vector<2x8x256xf32>
    %c0_39 = arith.constant 0 : index
    %c0_40 = arith.constant 0 : index
    %c0_41 = arith.constant 0 : index
    %c0_42 = arith.constant 0 : index
    %52 = vector.load %arg5[%c0_39, %c0_40, %c0_41, %c0_42] : memref<1x2x8x256xf32, #tpu.memory_space<vmem>>, vector<1x2x8x256xf32>
    %53 = vector.shape_cast %52 : vector<1x2x8x256xf32> to vector<2x8x256xf32>
    %54 = vector.shape_cast %51 : vector<2x8x256xf32> to vector<1x2x8x256xf32>
    tpu.vector_store %arg5[%c0_39, %c0_40, %c0_41, %c0_42], %54 {strides = array<i32>} : memref<1x2x8x256xf32, #tpu.memory_space<vmem>>, vector<1x2x8x256xf32>,
    return
  }
  func.func @transform_0(%arg0: i32) -> (i32, i32, i32, i32) {
    %c0_i32 = arith.constant 0 : i32
    %c0_i32_0 = arith.constant 0 : i32
    %c0_i32_1 = arith.constant 0 : i32
    %c0_i32_2 = arith.constant 0 : i32
    return %arg0, %c0_i32, %c0_i32_0, %c0_i32_1 : i32, i32, i32, i32
  }
  func.func @transform_1(%arg0: i32) -> (i32, i32, i32) {
    %c0_i32 = arith.constant 0 : i32
    %c0_i32_0 = arith.constant 0 : i32
    %c0_i32_1 = arith.constant 0 : i32
    %c0_i32_2 = arith.constant 0 : i32
    return %c0_i32, %c0_i32_0, %c0_i32_1 : i32, i32, i32
  }
  func.func @transform_2(%arg0: i32) -> (i32, i32) {
    %c0_i32 = arith.constant 0 : i32
    %c0_i32_0 = arith.constant 0 : i32
    %c0_i32_1 = arith.constant 0 : i32
    return %c0_i32, %c0_i32_0 : i32, i32
  }
  func.func @transform_3(%arg0: i32) -> (i32, i32, i32, i32) {
    %c0_i32 = arith.constant 0 : i32
    %c0_i32_0 = arith.constant 0 : i32
    %c0_i32_1 = arith.constant 0 : i32
    %c0_i32_2 = arith.constant 0 : i32
    return %arg0, %c0_i32, %c0_i32_0, %c0_i32_1 : i32, i32, i32, i32
  }
  func.func @transform_4(%arg0: i32) -> (i32, i32, i32, i32) {
    %c0_i32 = arith.constant 0 : i32
    %c0_i32_0 = arith.constant 0 : i32
    %c0_i32_1 = arith.constant 0 : i32
    %c0_i32_2 = arith.constant 0 : i32
    return %arg0, %c0_i32, %c0_i32_0, %c0_i32_1 : i32, i32, i32, i32
  }
}

</mosaic_0001>

<bundles_post_ra>
// kernel: tpu_custom_call.1
= control target key start
LH: loop header
LB: loop body
LE: loop exit
PB: predicated region body
PF: predicated region fallthrough
CT: control target
= control target key end

     0   :  { %10 = vsyncpa [#allocation3], 0  ;;  %s3308_s0 = inlined_call_operand.vmem [shape: f32[2,9,9,512], index: 0, kind: input, shape index: {}]   ;;  %s3309_s1 = inlined_call_operand.hbm [shape: f32[4,512,128], index: 1, kind: input, shape index: {}]   ;;  %s3310_s2 = inlined_call_operand.vmem [shape: f32[512,128], index: 2, kind: input, shape index: {}]   ;;  %s3311_s3 = inlined_call_operand.hbm [shape: f32[2,8,8,256], index: 3, kind: output, shape index: {0}]   ;;  %s3312_s4 = inlined_call_operand.hbm [shape: f32[2,2,8,256], index: 4, kind: output, shape index: {1}]  }
   0x1   :  { %11 = vsyncpa [#allocation4], 0 }
   0x2   :  { %13 = vsyncpa [#allocation4 + $0x1], 0 }
   0x3   :  { %14 = vsyncpa [#allocation7], 0 }
   0x4   :  { %16 = vsyncpa [#allocation7 + $0x1], 0  ;;  %s2537_s15 = smov 0   ;;  %s2539_s16 = smov 0  }
   0x5   :  { %s2541_s17 = smov 0   ;;  %s2543_s18 = smov 0  }
   0x6 LB: > { %s2558_s19 = sadd.s32 4294967295, %s2505_s18   ;;  %s2170_s20 = sadd.s32 4294967294, %s2505_s18   ;;  %s2505_s18 = sphi %s2543_s18, %s3318_s18   ;;  %s2501_s17 = sphi %s2541_s17, %s3317_s17   ;;  %s2497_s16 = sphi %s2539_s16, %s3316_s16   ;;  %s2493_s15 = sphi %s2537_s15, %s3315_s15  }
   0x7   : > { %s2562_s21 = sadd.s32 1, %s2505_s18   ;;  %s97_s22 = sadd.s32 1, %s2501_s17 }
   0x8   : > { %s94_s23 = ssub.s32 %s2505_s18, %s2562_s21  ;;  %p107_p0 = scmp.ne.s32.totalorder %s2501_s17, %s2497_s16 }
   0x9   : > { %p95_p1 = scmp.eq.s32.totalorder %s94_s23, 0  ;;  %p108_p2 = scmp.eq.s32.totalorder %s2558_s19, 1 }
   0xa   : > { %p113_p3 = scmp.ne.s32.totalorder %s2497_s16, %s2493_s15  ;;  %p114_p4 = scmp.eq.s32.totalorder %s2170_s20, 1 }
   0xb   : > { %s2573_s24 = scalar_select %p95_p1, %s2501_s17, %s97_s22  }
   0xc   : > { %p2575_p5 = por %p108_p2, %p107_p0  ;;  %p2579_p6 = por %p114_p4, %p113_p3 }
   0xd   : > { %p2171_p7 = scmp.ge.s32.totalorder %s2505_s18, 1  ;;  %p147_p8 = scmp.lt.s32.totalorder %s2505_s18, 3 }
   0xe   : > { %p2305_p9 = scmp.eq.s32.totalorder %s2558_s19, 0  ;;  %s158_s29 = sshll.u32 %s3309_s1, 4  ;;  %s159_s29 = int_to_ptr.hbm [resolvable:$true] %s158_s29 }
   0xf   : > { %p148_p10 = pnand %p2171_p7, %p147_p8  ;;  %s2507_s30 = smov [#allocation2]  }
  0x10   : > { %s160_s5 = sshll.u32 %s2507_s30, 4  ;;  %s2508_s6 = smov 128   ;;  %s161_s5 = int_to_ptr.vmem [resolvable:$true] %s160_s5 }
  0x11   : > { %p2294_p11 = pneg %p148_p10  ;;  %s2509_s7 = smov 8  }
  0x12   : > { %187 = sbr.rel (%p148_p10) target bundleno = 524 (0x20c), region = 32 }
  0x13   : > { %p2295_p12 = pnand %p2305_p9, %p2294_p11 }
  0x15   : > { %2297 = dma.hbm_to_vmem [thread:$0]  (!%p2295_p12), %s159_s29, 32768, %s161_s5, [#allocation3], %s2508_s6, %s2508_s6, %s2509_s7  }
  0x17   : > { %2480 = dma.done.wait (%p2305_p9), [#allocation3], 32768  }
  0x18   : > { %2482 = vsyncadd (%p2305_p9), [#allocation3], 4294934528  ;;  %v335_v0 = vld [vmem:[%s3310_s2 + $0x78] sm:$0xff]  ;;  %v334_v2 = vld [vmem:[%s3310_s2 + $0x70] sm:$0xff]  ;;  %p219_p13 = scmp.lt.s32.totalorder %s2558_s19, 1  ;;  %vm676_vm0 = vcmask 1046528  }
  0x19   : > { %v367_v1 = vld [vmem:[%s3310_s2 + $0x178] sm:$0xff]  ;;  %384 = vmatpush.msra.mxu0 %v335_v0  ;;  %v366_v4 = vld [vmem:[%s3310_s2 + $0x170] sm:$0xff]  ;;  %v333_v6 = vld [vmem:[%s3310_s2 + $0x68] sm:$0xff]  ;;  %s2930_s5 = sand.u32 1, %s2497_s16   ;;  %s2284_s22 = sshll.u32 %s2558_s19, 5 }
  0x1a   : > { %466 = vmatpush.msra.mxu2 %v367_v1  ;;  %v351_v3 = vld [vmem:[%s3310_s2 + $0xf8] sm:$0xff]  ;;  %v350_v7 = vld [vmem:[%s3310_s2 + $0xf0] sm:$0xff]  ;;  %v365_v8 = vld [vmem:[%s3310_s2 + $0x168] sm:$0xff]  ;;  %s2725_s7 = scalar_select %p219_p13, %s2558_s19, 1 }
  0x1b   : > { %v383_v5 = vld [vmem:[%s3310_s2 + $0x1f8] sm:$0xff]  ;;  %425 = vmatpush.msra.mxu1 %v351_v3  ;;  %385 = vmatpush.msra.mxu0 %v334_v2  ;;  %v382_v9 = vld [vmem:[%s3310_s2 + $0x1f0] sm:$0xff]  ;;  %v349_v10 = vld [vmem:[%s3310_s2 + $0xe8] sm:$0xff]  ;;  %s2176_s6 = sshll.u32 %s2930_s5, 7  ;;  %s2177_s10 = sshll.u32 %s2930_s5, 5 }
  0x1c   : > { %507 = vmatpush.msra.mxu3 %v383_v5  ;;  %467 = vmatpush.msra.mxu2 %v366_v4  ;;  %v332_v11 = vld [vmem:[%s3310_s2 + $0x60] sm:$0xff]  ;;  %v381_v13 = vld [vmem:[%s3310_s2 + $0x1e8] sm:$0xff]  ;;  %v331_v16 = vld [vmem:[%s3310_s2 + $0x58] sm:$0xff]  ;;  %s2285_s8 = smul.u32 576, %s2725_s7  ;;  %s2939_s9 = scalar_lea.vmem [#allocation5], %s2176_s6 }
  0x1d   : > { %426 = vmatpush.msra.mxu1 %v350_v7  ;;  %v364_v12 = vld [vmem:[%s3310_s2 + $0x160] sm:$0xff]  ;;  %386 = vmatpush.msra.mxu0 %v333_v6  ;;  %v363_v17 = vld [vmem:[%s3310_s2 + $0x158] sm:$0xff]  ;;  %v330_v20 = vld [vmem:[%s3310_s2 + $0x50] sm:$0xff]  ;;  %s3016_s12 = scalar_lea.vmem [#allocation6], %s2177_s10  ;;  %s2043_s7 = sshll.u32 %s2939_s9, 4  ;;  %s2044_s7 = int_to_ptr.vmem [resolvable:$true] %s2043_s7 }
  0x1e   : > { %508 = vmatpush.msra.mxu3 %v382_v9  ;;  %468 = vmatpush.msra.mxu2 %v365_v8  ;;  %v348_v14 = vld [vmem:[%s3310_s2 + $0xe0] sm:$0xff]  ;;  %v347_v18 = vld [vmem:[%s3310_s2 + $0xd8] sm:$0xff]  ;;  %v362_v21 = vld [vmem:[%s3310_s2 + $0x150] sm:$0xff]  ;;  %s2779_s11 = scalar_lea.vmem %s3308_s0, %s2285_s8  ;;  %s2060_s23 = sshll.u32 %s3016_s12, 4  ;;  %s3263_s23 = int_to_ptr.vmem [resolvable:$true] %s2060_s23 }
  0x1f   : > { %v380_v15 = vld [vmem:[%s3310_s2 + $0x1e0] sm:$0xff]  ;;  %427 = vmatpush.msra.mxu1 %v349_v10  ;;  %387 = vmatpush.msra.mxu0 %v332_v11  ;;  %v379_v19 = vld [vmem:[%s3310_s2 + $0x1d8] sm:$0xff]  ;;  %v346_v22 = vld [vmem:[%s3310_s2 + $0xd0] sm:$0xff]  ;;  %s3260_s29 = scalar_lea.hbm %s3312_s4, %s2284_s22  ;;  %s2026_s30 = scalar_lea.sflag [#allocation4], %s2930_s5 }
  0x20   : > { %509 = vmatpush.msra.mxu3 %v381_v13  ;;  %469 = vmatpush.msra.mxu2 %v364_v12  ;;  %v378_v23 = vld [vmem:[%s3310_s2 + $0x1d0] sm:$0xff]  ;;  %v329_v24 = vld [vmem:[%s3310_s2 + $0x48] sm:$0xff]  ;;  %v328_v28 = vld [vmem:[%s3310_s2 + $0x40] sm:$0xff]  ;;  %s2427_s14 = scalar_lea.hbm %s3311_s3, 256 }
  0x21   : > { %428 = vmatpush.msra.mxu1 %v348_v14  ;;  %388 = vmatpush.msra.mxu0 %v331_v16  ;;  %v361_v25 = vld [vmem:[%s3310_s2 + $0x148] sm:$0xff]  ;;  %v360_v29 = vld [vmem:[%s3310_s2 + $0x140] sm:$0xff]  ;;  %v327_v32 = vld [vmem:[%s3310_s2 + $0x38] sm:$0xff] }
  0x22   : > { %510 = vmatpush.msra.mxu3 %v380_v15  ;;  %470 = vmatpush.msra.mxu2 %v363_v17  ;;  %v345_v26 = vld [vmem:[%s3310_s2 + $0xc8] sm:$0xff]  ;;  %v344_v30 = vld [vmem:[%s3310_s2 + $0xc0] sm:$0xff]  ;;  %v359_v33 = vld [vmem:[%s3310_s2 + $0x138] sm:$0xff] }
  0x23   : > { %429 = vmatpush.msra.mxu1 %v347_v18  ;;  %389 = vmatpush.msra.mxu0 %v330_v20  ;;  %v377_v27 = vld [vmem:[%s3310_s2 + $0x1c8] sm:$0xff]  ;;  %v376_v31 = vld [vmem:[%s3310_s2 + $0x1c0] sm:$0xff]  ;;  %v343_v34 = vld [vmem:[%s3310_s2 + $0xb8] sm:$0xff] }
  0x24   : > { %511 = vmatpush.msra.mxu3 %v379_v19  ;;  %471 = vmatpush.msra.mxu2 %v362_v21  ;;  %v375_v35 = vld [vmem:[%s3310_s2 + $0x1b8] sm:$0xff]  ;;  %v326_v36 = vld [vmem:[%s3310_s2 + $0x30] sm:$0xff]  ;;  %v325_v40 = vld [vmem:[%s3310_s2 + $0x28] sm:$0xff] }
  0x25   : > { %430 = vmatpush.msra.mxu1 %v346_v22  ;;  %390 = vmatpush.msra.mxu0 %v329_v24  ;;  %v358_v37 = vld [vmem:[%s3310_s2 + $0x130] sm:$0xff]  ;;  %v357_v41 = vld [vmem:[%s3310_s2 + $0x128] sm:$0xff]  ;;  %v324_v44 = vld [vmem:[%s3310_s2 + $0x20] sm:$0xff] }
  0x26   : > { %512 = vmatpush.msra.mxu3 %v378_v23  ;;  %472 = vmatpush.msra.mxu2 %v361_v25  ;;  %v342_v38 = vld [vmem:[%s3310_s2 + $0xb0] sm:$0xff]  ;;  %v341_v42 = vld [vmem:[%s3310_s2 + $0xa8] sm:$0xff]  ;;  %v356_v45 = vld [vmem:[%s3310_s2 + $0x120] sm:$0xff] }
  0x27   : > { %431 = vmatpush.msra.mxu1 %v345_v26  ;;  %391 = vmatpush.msra.mxu0 %v328_v28  ;;  %v374_v39 = vld [vmem:[%s3310_s2 + $0x1b0] sm:$0xff]  ;;  %v373_v43 = vld [vmem:[%s3310_s2 + $0x1a8] sm:$0xff]  ;;  %v340_v46 = vld [vmem:[%s3310_s2 + $0xa0] sm:$0xff] }
  0x28   : > { %513 = vmatpush.msra.mxu3 %v377_v27  ;;  %473 = vmatpush.msra.mxu2 %v360_v29  ;;  %v372_v47 = vld [vmem:[%s3310_s2 + $0x1a0] sm:$0xff]  ;;  %v323_v48 = vld [vmem:[%s3310_s2 + $0x18] sm:$0xff]  ;;  %v322_v52 = vld [vmem:[%s3310_s2 + $0x10] sm:$0xff] }
  0x29   : > { %432 = vmatpush.msra.mxu1 %v344_v30  ;;  %392 = vmatpush.msra.mxu0 %v327_v32  ;;  %v355_v49 = vld [vmem:[%s3310_s2 + $0x118] sm:$0xff]  ;;  %v354_v53 = vld [vmem:[%s3310_s2 + $0x110] sm:$0xff]  ;;  %v321_v56 = vld [vmem:[%s3310_s2 + $0x8] sm:$0xff] }
  0x2a   : > { %514 = vmatpush.msra.mxu3 %v376_v31  ;;  %474 = vmatpush.msra.mxu2 %v359_v33  ;;  %v339_v50 = vld [vmem:[%s3310_s2 + $0x98] sm:$0xff]  ;;  %v338_v54 = vld [vmem:[%s3310_s2 + $0x90] sm:$0xff]  ;;  %v353_v57 = vld [vmem:[%s3310_s2 + $0x108] sm:$0xff] }
  0x2b   : > { %433 = vmatpush.msra.mxu1 %v343_v34  ;;  %393 = vmatpush.msra.mxu0 %v326_v36  ;;  %v371_v51 = vld [vmem:[%s3310_s2 + $0x198] sm:$0xff]  ;;  %v370_v55 = vld [vmem:[%s3310_s2 + $0x190] sm:$0xff]  ;;  %v337_v58 = vld [vmem:[%s3310_s2 + $0x88] sm:$0xff] }
  0x2c   : > { %515 = vmatpush.msra.mxu3 %v375_v35  ;;  %475 = vmatpush.msra.mxu2 %v358_v37  ;;  %v369_v59 = vld [vmem:[%s3310_s2 + $0x188] sm:$0xff]  ;;  %v320_v60 = vld [vmem:[%s3310_s2] sm:$0xff]  ;;  %v226_v63 = vld [vmem:[%s2779_s11 + $0x10] sm:$0xff] }
  0x2d   : > { %434 = vmatpush.msra.mxu1 %v342_v38  ;;  %394 = vmatpush.msra.mxu0 %v325_v40  ;;  %v352_v61 = vld [vmem:[%s3310_s2 + $0x100] sm:$0xff]  ;;  %v853_v0 = vld [vmem:[#allocation2 + $0x378] sm:$0xff]  ;;  %v225_v3 = vld [vmem:[%s2779_s11 + $0x8] sm:$0xff] }
  0x2e   : > { %516 = vmatpush.msra.mxu3 %v374_v39  ;;  %476 = vmatpush.msra.mxu2 %v357_v41  ;;  %v224_v62 = vld [vmem:[%s2779_s11] sm:$0xff]  ;;  %v227_v4 = vld [vmem:[%s2779_s11 + $0x18] sm:$0xff]  ;;  %v852_v8 = vld [vmem:[#allocation2 + $0x370] sm:$0xff] }
  0x2f   : > { %435 = vmatpush.msra.mxu1 %v341_v42  ;;  %395 = vmatpush.msra.mxu0 %v324_v44  ;;  %v336_v1 = vld [vmem:[%s3310_s2 + $0x80] sm:$0xff]  ;;  %v821_v5 = vld [vmem:[#allocation2 + $0x278] sm:$0xff]  ;;  %v820_v9 = vld [vmem:[#allocation2 + $0x270] sm:$0xff] }
  0x30   : > { %517 = vmatpush.msra.mxu3 %v373_v43  ;;  %477 = vmatpush.msra.mxu2 %v356_v45  ;;  %v368_v2 = vld [vmem:[%s3310_s2 + $0x180] sm:$0xff]  ;;  %v869_v6 = vld [vmem:[#allocation2 + $0x3f8] sm:$0xff]  ;;  %v868_v10 = vld [vmem:[#allocation2 + $0x3f0] sm:$0xff] }
  0x31   : > { %436 = vmatpush.msra.mxu1 %v340_v46  ;;  %396 = vmatpush.msra.mxu0 %v323_v48  ;;  %v837_v7 = vld [vmem:[#allocation2 + $0x2f8] sm:$0xff]  ;;  %v836_v11 = vld [vmem:[#allocation2 + $0x2f0] sm:$0xff]  ;;  %v851_v12 = vld [vmem:[#allocation2 + $0x368] sm:$0xff] }
  0x32   : > { %518 = vmatpush.msra.mxu3 %v372_v47  ;;  %478 = vmatpush.msra.mxu2 %v355_v49  ;;  %v819_v13 = vld [vmem:[#allocation2 + $0x268] sm:$0xff]  ;;  %v228_v14 = vld [vmem:[%s2779_s11 + $0x40] sm:$0xff]  ;;  %v230_v15 = vld [vmem:[%s2779_s11 + $0x50] sm:$0xff] }
  0x33   : > { %437 = vmatpush.msra.mxu1 %v339_v50  ;;  %397 = vmatpush.msra.mxu0 %v322_v52  ;;  %v867_v16 = vld [vmem:[#allocation2 + $0x3e8] sm:$0xff]  ;;  %v850_v19 = vld [vmem:[#allocation2 + $0x360] sm:$0xff]  ;;  %v231_v20 = vld [vmem:[%s2779_s11 + $0x58] sm:$0xff] }
  0x34   : > { %519 = vmatpush.msra.mxu3 %v371_v51  ;;  %479 = vmatpush.msra.mxu2 %v354_v53  ;;  %v835_v17 = vld [vmem:[#allocation2 + $0x2e8] sm:$0xff]  ;;  %v818_v21 = vld [vmem:[#allocation2 + $0x260] sm:$0xff]  ;;  %v849_v24 = vld [vmem:[#allocation2 + $0x358] sm:$0xff] }
  0x35   : > { %438 = vmatpush.msra.mxu1 %v338_v54  ;;  %398 = vmatpush.msra.mxu0 %v321_v56  ;;  %v229_v18 = vld [vmem:[%s2779_s11 + $0x48] sm:$0xff]  ;;  %v866_v22 = vld [vmem:[#allocation2 + $0x3e0] sm:$0xff]  ;;  %v817_v25 = vld [vmem:[#allocation2 + $0x258] sm:$0xff] }
  0x36   : > { %520 = vmatpush.msra.mxu3 %v370_v55  ;;  %480 = vmatpush.msra.mxu2 %v353_v57  ;;  %v834_v23 = vld [vmem:[#allocation2 + $0x2e0] sm:$0xff]  ;;  %v865_v26 = vld [vmem:[#allocation2 + $0x3d8] sm:$0xff]  ;;  %v848_v28 = vld [vmem:[#allocation2 + $0x350] sm:$0xff] }
  0x37   : > { %439 = vmatpush.msra.mxu1 %v337_v58  ;;  %399 = vmatpush.msra.mxu0 %v320_v60  ;;  %v833_v27 = vld [vmem:[#allocation2 + $0x2d8] sm:$0xff]  ;;  %v816_v29 = vld [vmem:[#allocation2 + $0x250] sm:$0xff]  ;;  %v232_v30 = vld [vmem:[%s2779_s11 + $0x80] sm:$0xff] }
  0x38   : > { %521 = vmatpush.msra.mxu3 %v369_v59  ;;  %481 = vmatpush.msra.mxu2 %v352_v61  ;;  %v234_v31 = vld [vmem:[%s2779_s11 + $0x90] sm:$0xff]  ;;  %v233_v34 = vld [vmem:[%s2779_s11 + $0x88] sm:$0xff]  ;;  %v235_v36 = vld [vmem:[%s2779_s11 + $0x98] sm:$0xff] }
  0x39   : > { %400 = vmatmul.f32.vlgmr.msra.gmra.mxu0 %v224_v62  ;;  %482 = vmatmul.f32.vlgmr.msra.gmra.mxu2 %v226_v63  ;;  %v864_v32 = vld [vmem:[#allocation2 + $0x3d0] sm:$0xff]  ;;  %v847_v35 = vld [vmem:[#allocation2 + $0x348] sm:$0xff]  ;;  %v846_v40 = vld [vmem:[#allocation2 + $0x340] sm:$0xff] }
  0x3a   : > { %952 = vmatpush.msrb.mxu2 %v853_v0  ;;  %440 = vmatpush.msra.mxu1 %v336_v1  ;;  %v832_v33 = vld [vmem:[#allocation2 + $0x2d0] sm:$0xff]  ;;  %v815_v37 = vld [vmem:[#allocation2 + $0x248] sm:$0xff]  ;;  %v814_v41 = vld [vmem:[#allocation2 + $0x240] sm:$0xff] }
  0x3b   : > { %522 = vmatpush.msra.mxu3 %v368_v2  ;;  %441 = vmatmul.f32.vlgmr.msra.gmra.mxu1 %v225_v3  ;;  %v863_v38 = vld [vmem:[#allocation2 + $0x3c8] sm:$0xff]  ;;  %v862_v42 = vld [vmem:[#allocation2 + $0x3c0] sm:$0xff]  ;;  %v845_v44 = vld [vmem:[#allocation2 + $0x338] sm:$0xff] }
  0x3c   : > { %523 = vmatmul.f32.vlgmr.msra.gmra.mxu3 %v227_v4  ;;  %870 = vmatpush.msrb.mxu0 %v821_v5  ;;  %v831_v39 = vld [vmem:[#allocation2 + $0x2c8] sm:$0xff]  ;;  %v830_v43 = vld [vmem:[#allocation2 + $0x2c0] sm:$0xff]  ;;  %v813_v45 = vld [vmem:[#allocation2 + $0x238] sm:$0xff] }
  0x3d   : > { %993 = vmatpush.msrb.mxu3 %v869_v6  ;;  %911 = vmatpush.msrb.mxu1 %v837_v7  ;;  %v236_v46 = vld [vmem:[%s2779_s11 + $0xc0] sm:$0xff]  ;;  %v238_v47 = vld [vmem:[%s2779_s11 + $0xd0] sm:$0xff]  ;;  %v861_v48 = vld [vmem:[#allocation2 + $0x3b8] sm:$0xff] }
  0x3e   : > { %953 = vmatpush.msrb.mxu2 %v852_v8  ;;  %871 = vmatpush.msrb.mxu0 %v820_v9  ;;  %v829_v49 = vld [vmem:[#allocation2 + $0x2b8] sm:$0xff]  ;;  %v237_v50 = vld [vmem:[%s2779_s11 + $0xc8] sm:$0xff]  ;;  %v844_v51 = vld [vmem:[#allocation2 + $0x330] sm:$0xff] }
  0x3f   : > { %994 = vmatpush.msrb.mxu3 %v868_v10  ;;  %912 = vmatpush.msrb.mxu1 %v836_v11  ;;  %v239_v52 = vld [vmem:[%s2779_s11 + $0xd8] sm:$0xff]  ;;  %v812_v53 = vld [vmem:[#allocation2 + $0x230] sm:$0xff]  ;;  %v843_v56 = vld [vmem:[#allocation2 + $0x328] sm:$0xff] }
  0x40   : > { %954 = vmatpush.msrb.mxu2 %v851_v12  ;;  %872 = vmatpush.msrb.mxu0 %v819_v13  ;;  %v860_v54 = vld [vmem:[#allocation2 + $0x3b0] sm:$0xff]  ;;  %v811_v57 = vld [vmem:[#allocation2 + $0x228] sm:$0xff]  ;;  %v842_v60 = vld [vmem:[#allocation2 + $0x320] sm:$0xff] }
  0x41   : > { %403 = vmatmul.f32.gmra.mxu0 %v228_v14  ;;  %485 = vmatmul.f32.gmra.mxu2 %v230_v15  ;;  %v828_v55 = vld [vmem:[#allocation2 + $0x2b0] sm:$0xff]  ;;  %v859_v58 = vld [vmem:[#allocation2 + $0x3a8] sm:$0xff]  ;;  %v810_v61 = vld [vmem:[#allocation2 + $0x220] sm:$0xff] }
  0x42   : > { %995 = vmatpush.msrb.mxu3 %v867_v16  ;;  %913 = vmatpush.msrb.mxu1 %v835_v17  ;;  %v827_v59 = vld [vmem:[#allocation2 + $0x2a8] sm:$0xff]  ;;  %v240_v62 = vld [vmem:[%s2779_s11 + $0x100] sm:$0xff]  ;;  %v242_v63 = vld [vmem:[%s2779_s11 + $0x110] sm:$0xff] }
  0x43   : > { %444 = vmatmul.f32.gmra.mxu1 %v229_v18  ;;  %955 = vmatpush.msrb.mxu2 %v850_v19  ;;  %v858_v0 = vld [vmem:[#allocation2 + $0x3a0] sm:$0xff]  ;;  %v241_v2 = vld [vmem:[%s2779_s11 + $0x108] sm:$0xff]  ;;  %v841_v3 = vld [vmem:[#allocation2 + $0x318] sm:$0xff] }
  0x44   : > { %526 = vmatmul.f32.gmra.mxu3 %v231_v20  ;;  %873 = vmatpush.msrb.mxu0 %v818_v21  ;;  %v826_v1 = vld [vmem:[#allocation2 + $0x2a0] sm:$0xff]  ;;  %v243_v4 = vld [vmem:[%s2779_s11 + $0x118] sm:$0xff]  ;;  %v840_v8 = vld [vmem:[#allocation2 + $0x310] sm:$0xff] }
  0x45   : > { %996 = vmatpush.msrb.mxu3 %v866_v22  ;;  %914 = vmatpush.msrb.mxu1 %v834_v23  ;;  %v809_v5 = vld [vmem:[#allocation2 + $0x218] sm:$0xff]  ;;  %v808_v9 = vld [vmem:[#allocation2 + $0x210] sm:$0xff]  ;;  %v839_v12 = vld [vmem:[#allocation2 + $0x308] sm:$0xff] }
  0x46   : > { %956 = vmatpush.msrb.mxu2 %v849_v24  ;;  %874 = vmatpush.msrb.mxu0 %v817_v25  ;;  %v857_v6 = vld [vmem:[#allocation2 + $0x398] sm:$0xff]  ;;  %v856_v10 = vld [vmem:[#allocation2 + $0x390] sm:$0xff]  ;;  %v807_v13 = vld [vmem:[#allocation2 + $0x208] sm:$0xff] }
  0x47   : > { %997 = vmatpush.msrb.mxu3 %v865_v26  ;;  %915 = vmatpush.msrb.mxu1 %v833_v27  ;;  %v825_v7 = vld [vmem:[#allocation2 + $0x298] sm:$0xff]  ;;  %v824_v11 = vld [vmem:[#allocation2 + $0x290] sm:$0xff]  ;;  %v244_v14 = vld [vmem:[%s2779_s11 + $0x140] sm:$0xff] }
  0x48   : > { %957 = vmatpush.msrb.mxu2 %v848_v28  ;;  %875 = vmatpush.msrb.mxu0 %v816_v29  ;;  %v246_v15 = vld [vmem:[%s2779_s11 + $0x150] sm:$0xff]  ;;  %v855_v16 = vld [vmem:[#allocation2 + $0x388] sm:$0xff]  ;;  %v838_v19 = vld [vmem:[#allocation2 + $0x300] sm:$0xff] }
  0x49   : > { %406 = vmatmul.f32.gmra.mxu0 %v232_v30  ;;  %488 = vmatmul.f32.gmra.mxu2 %v234_v31  ;;  %v823_v17 = vld [vmem:[#allocation2 + $0x288] sm:$0xff]  ;;  %v247_v20 = vld [vmem:[%s2779_s11 + $0x158] sm:$0xff]  ;;  %v806_v21 = vld [vmem:[#allocation2 + $0x200] sm:$0xff] }
  0x4a   : > { %998 = vmatpush.msrb.mxu3 %v864_v32  ;;  %916 = vmatpush.msrb.mxu1 %v832_v33  ;;  %v245_v18 = vld [vmem:[%s2779_s11 + $0x148] sm:$0xff]  ;;  %v854_v22 = vld [vmem:[#allocation2 + $0x380] sm:$0xff]  ;;  %v303_v24 = vld [vmem:[#allocation2 + $0x178] sm:$0xff] }
  0x4b   : > { %447 = vmatmul.f32.gmra.mxu1 %v233_v34  ;;  %958 = vmatpush.msrb.mxu2 %v847_v35  ;;  %v822_v23 = vld [vmem:[#allocation2 + $0x280] sm:$0xff]  ;;  %v319_v25 = vld [vmem:[#allocation2 + $0x1f8] sm:$0xff]  ;;  %v302_v28 = vld [vmem:[#allocation2 + $0x170] sm:$0xff] }
  0x4c   : > { %529 = vmatmul.f32.gmra.mxu3 %v235_v36  ;;  %876 = vmatpush.msrb.mxu0 %v815_v37  ;;  %v271_v26 = vld [vmem:[#allocation2 + $0x78] sm:$0xff]  ;;  %v318_v29 = vld [vmem:[#allocation2 + $0x1f0] sm:$0xff]  ;;  %v248_v30 = vld [vmem:[%s2779_s11 + $0x180] sm:$0xff] }
  0x4d   : > { %999 = vmatpush.msrb.mxu3 %v863_v38  ;;  %917 = vmatpush.msrb.mxu1 %v831_v39  ;;  %v287_v27 = vld [vmem:[#allocation2 + $0xf8] sm:$0xff]  ;;  %v250_v31 = vld [vmem:[%s2779_s11 + $0x190] sm:$0xff]  ;;  %v249_v34 = vld [vmem:[%s2779_s11 + $0x188] sm:$0xff] }
  0x4e   : > { %959 = vmatpush.msrb.mxu2 %v846_v40  ;;  %877 = vmatpush.msrb.mxu0 %v814_v41  ;;  %v270_v32 = vld [vmem:[#allocation2 + $0x70] sm:$0xff]  ;;  %v301_v35 = vld [vmem:[#allocation2 + $0x168] sm:$0xff]  ;;  %v251_v36 = vld [vmem:[%s2779_s11 + $0x198] sm:$0xff] }
  0x4f   : > { %1000 = vmatpush.msrb.mxu3 %v862_v42  ;;  %918 = vmatpush.msrb.mxu1 %v830_v43  ;;  %v286_v33 = vld [vmem:[#allocation2 + $0xf0] sm:$0xff]  ;;  %v269_v37 = vld [vmem:[#allocation2 + $0x68] sm:$0xff]  ;;  %v300_v40 = vld [vmem:[#allocation2 + $0x160] sm:$0xff] }
  0x50   : > { %960 = vmatpush.msrb.mxu2 %v845_v44  ;;  %878 = vmatpush.msrb.mxu0 %v813_v45  ;;  %v317_v38 = vld [vmem:[#allocation2 + $0x1e8] sm:$0xff]  ;;  %v268_v41 = vld [vmem:[#allocation2 + $0x60] sm:$0xff]  ;;  %v254_v43 = vld [vmem:[%s2779_s11 + $0x1d0] sm:$0xff] }
  0x51   : > { %409 = vmatmul.f32.gmra.mxu0 %v236_v46  ;;  %491 = vmatmul.f32.gmra.mxu2 %v238_v47  ;;  %v285_v39 = vld [vmem:[#allocation2 + $0xe8] sm:$0xff]  ;;  %v252_v42 = vld [vmem:[%s2779_s11 + $0x1c0] sm:$0xff]  ;;  %v299_v47 = vld [vmem:[#allocation2 + $0x158] sm:$0xff] }
  0x52   : > { %1001 = vmatpush.msrb.mxu3 %v861_v48  ;;  %919 = vmatpush.msrb.mxu1 %v829_v49  ;;  %v316_v44 = vld [vmem:[#allocation2 + $0x1e0] sm:$0xff]  ;;  %v267_v48 = vld [vmem:[#allocation2 + $0x58] sm:$0xff]  ;;  %v253_v49 = vld [vmem:[%s2779_s11 + $0x1c8] sm:$0xff] }
  0x53   : > { %450 = vmatmul.f32.gmra.mxu1 %v237_v50  ;;  %961 = vmatpush.msrb.mxu2 %v844_v51  ;;  %v284_v45 = vld [vmem:[#allocation2 + $0xe0] sm:$0xff]  ;;  %v550_v51 = vld [vmem:[%s2779_s11 + $0x10] sm:$0xfe] }
  0x54   : > { %532 = vmatmul.f32.gmra.mxu3 %v239_v52  ;;  %879 = vmatpush.msrb.mxu0 %v812_v53  ;;  %v548_v46 = vld [vmem:[%s2779_s11] sm:$0xfe]  ;;  %v552_v50 = vld [vmem:[%s2779_s11 + $0x20] sm:$0x1]  ;;  %v554_v52 = vld [vmem:[%s2779_s11 + $0x30] sm:$0x1] }
  0x55   : > { %1002 = vmatpush.msrb.mxu3 %v860_v54  ;;  %920 = vmatpush.msrb.mxu1 %v828_v55  ;;  %v315_v53 = vld [vmem:[#allocation2 + $0x1d8] sm:$0xff] }
  0x56   : > { %962 = vmatpush.msrb.mxu2 %v843_v56  ;;  %880 = vmatpush.msrb.mxu0 %v811_v57  ;;  %v283_v54 = vld [vmem:[#allocation2 + $0xd8] sm:$0xff]  ;;  %v677_v56 = vrot.slane %v548_v46, 1  ;;  %v549_v57 = vld [vmem:[%s2779_s11 + $0x8] sm:$0xfe]  ;;  %v566_v46 = vld [vmem:[%s2779_s11 + $0x90] sm:$0xfe] }
  0x57   : > { %1003 = vmatpush.msrb.mxu3 %v859_v58  ;;  %921 = vmatpush.msrb.mxu1 %v827_v59  ;;  %v255_v55 = vld [vmem:[%s2779_s11 + $0x1d8] sm:$0xff]  ;;  %v298_v58 = vld [vmem:[#allocation2 + $0x150] sm:$0xff]  ;;  %v678_v59 = vrot.slane %v552_v50, 1  ;;  %v569_v50 = vld [vmem:[%s2779_s11 + $0xa8] sm:$0x1] }
  0x58   : > { %963 = vmatpush.msrb.mxu2 %v842_v60  ;;  %881 = vmatpush.msrb.mxu0 %v810_v61  ;;  %v553_v60 = vld [vmem:[%s2779_s11 + $0x28] sm:$0x1]  ;;  %v551_v61 = vld [vmem:[%s2779_s11 + $0x18] sm:$0xfe] }
  0x59   : > { %412 = vmatmul.f32.gmra.mxu0 %v240_v62  ;;  %494 = vmatmul.f32.gmra.mxu2 %v242_v63  ;;  %v266_v62 = vld [vmem:[#allocation2 + $0x50] sm:$0xff]  ;;  %v683_v63 = vrot.slane %v550_v51, 1 }
  0x5a   : > { %1004 = vmatpush.msrb.mxu3 %v858_v0  ;;  %922 = vmatpush.msrb.mxu1 %v826_v1  ;;  %v684_v0 = vrot.slane %v554_v52, 1  ;;  %v555_v1 = vld [vmem:[%s2779_s11 + $0x38] sm:$0x1] }
  0x5b   : > { %453 = vmatmul.f32.gmra.mxu1 %v241_v2  ;;  %964 = vmatpush.msrb.mxu2 %v841_v3  ;;  %v314_v2 = vld [vmem:[#allocation2 + $0x1d0] sm:$0xff] }
  0x5c   : > { %535 = vmatmul.f32.gmra.mxu3 %v243_v4  ;;  %882 = vmatpush.msrb.mxu0 %v809_v5  ;;  %v282_v3 = vld [vmem:[#allocation2 + $0xd0] sm:$0xff]  ;;  %v297_v4 = vld [vmem:[#allocation2 + $0x148] sm:$0xff]  ;;  %v680_v5 = vrot.slane %v549_v57, 1  ;;  %v707_v57 = vrot.slane %v566_v46, 1 }
  0x5d   : > { %1005 = vmatpush.msrb.mxu3 %v857_v6  ;;  %923 = vmatpush.msrb.mxu1 %v825_v7  ;;  %v681_v6 = vrot.slane %v553_v60, 1  ;;  %v313_v7 = vld [vmem:[#allocation2 + $0x1c8] sm:$0xff]  ;;  %v571_v60 = vld [vmem:[%s2779_s11 + $0xb8] sm:$0x1]  ;;  %v258_v46 = vld [vmem:[#allocation2 + $0x10] sm:$0xff] }
  0x5e   : > { %965 = vmatpush.msrb.mxu2 %v840_v8  ;;  %883 = vmatpush.msrb.mxu0 %v808_v9  ;;  %v265_v8 = vld [vmem:[#allocation2 + $0x48] sm:$0xff] }
  0x5f   : > { %1006 = vmatpush.msrb.mxu3 %v856_v10  ;;  %924 = vmatpush.msrb.mxu1 %v824_v11  ;;  %v281_v9 = vld [vmem:[#allocation2 + $0xc8] sm:$0xff]  ;;  %v686_v10 = vrot.slane %v551_v61, 1  ;;  %v687_v11 = vrot.slane %v555_v1, 1 }
  0x60   : > { %966 = vmatpush.msrb.mxu2 %v839_v12  ;;  %884 = vmatpush.msrb.mxu0 %v807_v13  ;;  %v296_v12 = vld [vmem:[#allocation2 + $0x140] sm:$0xff]  ;;  %v679_v13 = vsel %vm676_vm0, %v677_v56, %v678_v59  ;;  %v293_v56 = vld [vmem:[#allocation2 + $0x128] sm:$0xff]  ;;  %v567_v59 = vld [vmem:[%s2779_s11 + $0x98] sm:$0xfe] }
  0x61   : > { %415 = vmatmul.f32.gmra.mxu0 %v244_v14  ;;  %497 = vmatmul.f32.gmra.mxu2 %v246_v15  ;;  %v685_v14 = vsel %vm676_vm0, %v683_v63, %v684_v0  ;;  %v556_v15 = vld [vmem:[%s2779_s11 + $0x40] sm:$0xfe]  ;;  %v309_v63 = vld [vmem:[#allocation2 + $0x1a8] sm:$0xff] }
  0x62   : > { %1007 = vmatpush.msrb.mxu3 %v855_v16  ;;  %925 = vmatpush.msrb.mxu1 %v823_v17  ;;  %v560_v16 = vld [vmem:[%s2779_s11 + $0x60] sm:$0x1]  ;;  %v558_v17 = vld [vmem:[%s2779_s11 + $0x50] sm:$0xfe]  ;;  %v261_v0 = vld [vmem:[#allocation2 + $0x28] sm:$0xff] }
  0x63   : > { %456 = vmatmul.f32.gmra.mxu1 %v245_v18  ;;  %967 = vmatpush.msrb.mxu2 %v838_v19  ;;  %v562_v18 = vld [vmem:[%s2779_s11 + $0x70] sm:$0x1]  ;;  %v312_v19 = vld [vmem:[#allocation2 + $0x1c0] sm:$0xff]  ;;  %v277_v1 = vld [vmem:[#allocation2 + $0xa8] sm:$0xff] }
  0x64   : > { %538 = vmatmul.f32.gmra.mxu3 %v247_v20  ;;  %885 = vmatpush.msrb.mxu0 %v806_v21  ;;  %v682_v20 = vsel %vm676_vm0, %v680_v5, %v681_v6  ;;  %v557_v21 = vld [vmem:[%s2779_s11 + $0x48] sm:$0xfe]  ;;  %v308_v5 = vld [vmem:[#allocation2 + $0x1a0] sm:$0xff] }
  0x65   : > { %1008 = vmatpush.msrb.mxu3 %v854_v22  ;;  %926 = vmatpush.msrb.mxu1 %v822_v23  ;;  %v561_v22 = vld [vmem:[%s2779_s11 + $0x68] sm:$0x1]  ;;  %v688_v23 = vsel %vm676_vm0, %v686_v10, %v687_v11  ;;  %v574_v10 = vld [vmem:[%s2779_s11 + $0xd0] sm:$0xfe]  ;;  %v578_v11 = vld [vmem:[%s2779_s11 + $0xf0] sm:$0x1] }
  0x66   : > { %1116 = vmatpush.msra.mxu2 %v303_v24  ;;  %1034 = vmatpush.msra.mxu0 %v271_v26  ;;  %v689_v24 = vrot.slane %v556_v15, 1  ;;  %v264_v26 = vld [vmem:[#allocation2 + $0x40] sm:$0xff] }
  0x67   : > { %1157 = vmatpush.msra.mxu3 %v319_v25  ;;  %1075 = vmatpush.msra.mxu1 %v287_v27  ;;  %v690_v25 = vrot.slane %v560_v16, 1  ;;  %v280_v27 = vld [vmem:[#allocation2 + $0xc0] sm:$0xff] }
  0x68   : > { %1117 = vmatpush.msra.mxu2 %v302_v28  ;;  %1035 = vmatpush.msra.mxu0 %v270_v32  ;;  %v295_v28 = vld [vmem:[#allocation2 + $0x138] sm:$0xff] }
  0x69   : > { %1158 = vmatpush.msra.mxu3 %v318_v29  ;;  %418 = vmatmul.f32.gmra.mxu0 %v248_v30  ;;  %v695_v29 = vrot.slane %v558_v17, 1  ;;  %v696_v30 = vrot.slane %v562_v18, 1  ;;  %v563_v32 = vld [vmem:[%s2779_s11 + $0x78] sm:$0x1]  ;;  %v260_v18 = vld [vmem:[#allocation2 + $0x20] sm:$0xff] }
  0x6a   : > { %500 = vmatmul.f32.gmra.mxu2 %v250_v31  ;;  %1076 = vmatpush.msra.mxu1 %v286_v33  ;;  %v559_v31 = vld [vmem:[%s2779_s11 + $0x58] sm:$0xfe]  ;;  %v692_v33 = vrot.slane %v557_v21, 1  ;;  %v719_v21 = vrot.slane %v574_v10, 1  ;;  %v593_v10 = vld [vmem:[%s2779_s11 + $0x168] sm:$0x1] }
  0x6b   : > { %459 = vmatmul.f32.gmra.mxu1 %v249_v34  ;;  %1118 = vmatpush.msra.mxu2 %v301_v35  ;;  %v693_v34 = vrot.slane %v561_v22, 1  ;;  %v311_v35 = vld [vmem:[#allocation2 + $0x1b8] sm:$0xff]  ;;  %v720_v22 = vrot.slane %v578_v11, 1  ;;  %v272_v11 = vld [vmem:[#allocation2 + $0x80] sm:$0xff] }
  0x6c   : > { %541 = vmatmul.f32.gmra.mxu3 %v251_v36  ;;  %1036 = vmatpush.msra.mxu0 %v269_v37  ;;  %v263_v36 = vld [vmem:[#allocation2 + $0x38] sm:$0xff] }
  0x6d   : > { %1159 = vmatpush.msra.mxu3 %v317_v38  ;;  %1077 = vmatpush.msra.mxu1 %v285_v39  ;;  %v279_v37 = vld [vmem:[#allocation2 + $0xb8] sm:$0xff]  ;;  %v698_v38 = vrot.slane %v559_v31, 1  ;;  %v699_v39 = vrot.slane %v563_v32, 1  ;;  %v290_v32 = vld [vmem:[#allocation2 + $0x110] sm:$0xff] }
  0x6e   : > { %1119 = vmatpush.msra.mxu2 %v300_v40  ;;  %1037 = vmatpush.msra.mxu0 %v268_v41  ;;  %v294_v40 = vld [vmem:[#allocation2 + $0x130] sm:$0xff] }
  0x6f   : > { %1160 = vmatpush.msra.mxu3 %v316_v44  ;;  %1078 = vmatpush.msra.mxu1 %v284_v45  ;;  %v310_v41 = vld [vmem:[#allocation2 + $0x1b0] sm:$0xff]  ;;  %v564_v44 = vld [vmem:[%s2779_s11 + $0x80] sm:$0xfe]  ;;  %v568_v45 = vld [vmem:[%s2779_s11 + $0xa0] sm:$0x1]  ;;  %v700_v51 = vsel %vm676_vm0, %v698_v38, %v699_v39 }
  0x70   : > { %1120 = vmatpush.msra.mxu2 %v299_v47  ;;  %1038 = vmatpush.msra.mxu0 %v267_v48  ;;  %v570_v47 = vld [vmem:[%s2779_s11 + $0xb0] sm:$0x1]  ;;  %v694_v48 = vsel %vm676_vm0, %v692_v33, %v693_v34  ;;  %v701_v52 = vrot.slane %v564_v44, 1  ;;  %v582_v38 = vld [vmem:[%s2779_s11 + $0x110] sm:$0xfe] }
  0x71   : > { %421 = vmatmul.f32.gmra.mxu0 %v252_v42  ;;  %1161 = vmatpush.msra.mxu3 %v315_v53  ;;  %v691_v42 = vsel %vm676_vm0, %v689_v24, %v690_v25  ;;  %v702_v53 = vrot.slane %v568_v45, 1  ;;  %v579_v24 = vld [vmem:[%s2779_s11 + $0xf8] sm:$0x1]  ;;  %v306_v33 = vld [vmem:[#allocation2 + $0x190] sm:$0xff] }
  0x72   : > { %503 = vmatmul.f32.gmra.mxu2 %v254_v43  ;;  %1079 = vmatpush.msra.mxu1 %v283_v54  ;;  %v697_v43 = vsel %vm676_vm0, %v695_v29, %v696_v30  ;;  %v262_v54 = vld [vmem:[#allocation2 + $0x30] sm:$0xff]  ;;  %v275_v29 = vld [vmem:[#allocation2 + $0x98] sm:$0xff]  ;;  %v723_v31 = vrot.slane %v579_v24, 1 }
  0x73   : > { %462 = vmatmul.f32.gmra.mxu1 %v253_v49  ;;  %1121 = vmatpush.msra.mxu2 %v298_v58  ;;  %v565_v49 = vld [vmem:[%s2779_s11 + $0x88] sm:$0xfe]  ;;  %v708_v58 = vrot.slane %v570_v47, 1  ;;  %v703_v6 = vsel %vm676_vm0, %v701_v52, %v702_v53  ;;  %v586_v39 = vld [vmem:[%s2779_s11 + $0x130] sm:$0x1]  ;;  %v1263_v24 = vld [vmem:[#allocation2 + $0x4f8] sm:$0xff] }
  0x74   : > { %544 = vmatmul.f32.gmra.mxu3 %v255_v55  ;;  %1039 = vmatpush.msra.mxu0 %v266_v62  ;;  %v278_v55 = vld [vmem:[#allocation2 + $0xb0] sm:$0xff]  ;;  %v704_v61 = vrot.slane %v565_v49, 1  ;;  %v705_v62 = vrot.slane %v569_v50, 1  ;;  %v731_v49 = vrot.slane %v582_v38, 1  ;;  %v732_v50 = vrot.slane %v586_v39, 1 }
  0x75   : > { %1162 = vmatpush.msra.mxu3 %v314_v2  ;;  %1080 = vmatpush.msra.mxu1 %v282_v3  ;;  %v710_v2 = vrot.slane %v567_v59, 1  ;;  %v711_v3 = vrot.slane %v571_v60, 1  ;;  %v274_v47 = vld [vmem:[#allocation2 + $0x90] sm:$0xff]  ;;  %v587_v52 = vld [vmem:[%s2779_s11 + $0x138] sm:$0x1]  ;;  %v288_v60 = vld [vmem:[#allocation2 + $0x100] sm:$0xff] }
  0x76   : > { %1122 = vmatpush.msra.mxu2 %v297_v4  ;;  %1040 = vmatpush.msra.mxu0 %v265_v8  ;;  %v292_v4 = vld [vmem:[#allocation2 + $0x120] sm:$0xff]  ;;  %v735_v59 = vrot.slane %v587_v52, 1 }
  0x77   : > { %1163 = vmatpush.msra.mxu3 %v313_v7  ;;  %1081 = vmatpush.msra.mxu1 %v281_v9  ;;  %v709_v7 = vsel %vm676_vm0, %v707_v57, %v708_v58  ;;  %v572_v8 = vld [vmem:[%s2779_s11 + $0xc0] sm:$0xfe]  ;;  %v576_v9 = vld [vmem:[%s2779_s11 + $0xe0] sm:$0x1]  ;;  %v712_v15 = vsel %vm676_vm0, %v710_v2, %v711_v3  ;;  %v273_v57 = vld [vmem:[#allocation2 + $0x88] sm:$0xff] }
  0x78   : > { %1123 = vmatpush.msra.mxu2 %v296_v12  ;;  %1041 = vmatpush.msra.mxu0 %v264_v26  ;;  %v706_v12 = vsel %vm676_vm0, %v704_v61, %v705_v62  ;;  %v713_v16 = vrot.slane %v572_v8, 1  ;;  %v714_v17 = vrot.slane %v576_v9, 1  ;;  %v733_v62 = vsel %vm676_vm0, %v731_v49, %v732_v50  ;;  %v590_v2 = vld [vmem:[%s2779_s11 + $0x150] sm:$0xfe]  ;;  %v594_v3 = vld [vmem:[%s2779_s11 + $0x170] sm:$0x1] }
  0x79   : > { %886 = vmatmul.f32.vlgmr.msrb.gmra.mxu0 %v679_v13  ;;  %1164 = vmatpush.msra.mxu3 %v312_v19  ;;  %v573_v13 = vld [vmem:[%s2779_s11 + $0xc8] sm:$0xfe]  ;;  %v276_v19 = vld [vmem:[#allocation2 + $0xa0] sm:$0xff] }
  0x7a   : > { %968 = vmatmul.f32.vlgmr.msrb.gmra.mxu2 %v685_v14  ;;  %1082 = vmatpush.msra.mxu1 %v280_v27  ;;  %v577_v14 = vld [vmem:[%s2779_s11 + $0xe8] sm:$0x1]  ;;  %v716_v25 = vrot.slane %v573_v13, 1  ;;  %v307_v27 = vld [vmem:[#allocation2 + $0x198] sm:$0xff]  ;;  %v715_v34 = vsel %vm676_vm0, %v713_v16, %v714_v17  ;;  %v743_v13 = vrot.slane %v590_v2, 1  ;;  %v1276_v52 = vld [vmem:[#allocation2 + $0x560] sm:$0xff] }
  0x7b   : > { %927 = vmatmul.f32.vlgmr.msrb.gmra.mxu1 %v682_v20  ;;  %1124 = vmatpush.msra.mxu2 %v295_v28  ;;  %v291_v20 = vld [vmem:[#allocation2 + $0x118] sm:$0xff]  ;;  %v717_v26 = vrot.slane %v577_v14, 1  ;;  %v744_v14 = vrot.slane %v594_v3, 1  ;;  %v1245_v50 = vld [vmem:[#allocation2 + $0x468] sm:$0xff] }
  0x7c   : > { %1009 = vmatmul.f32.vlgmr.msrb.gmra.mxu3 %v688_v23  ;;  %1042 = vmatpush.msra.mxu0 %v263_v36  ;;  %v575_v23 = vld [vmem:[%s2779_s11 + $0xd8] sm:$0xfe]  ;;  %v580_v36 = vld [vmem:[%s2779_s11 + $0x100] sm:$0xfe]  ;;  %v595_v16 = vld [vmem:[%s2779_s11 + $0x178] sm:$0x1] }
  0x7d   : > { %1165 = vmatpush.msra.mxu3 %v311_v35  ;;  %1083 = vmatpush.msra.mxu1 %v279_v37  ;;  %v259_v28 = vld [vmem:[#allocation2 + $0x18] sm:$0xff]  ;;  %v722_v30 = vrot.slane %v575_v23, 1  ;;  %v721_v35 = vsel %vm676_vm0, %v719_v21, %v720_v22  ;;  %v584_v37 = vld [vmem:[%s2779_s11 + $0x120] sm:$0x1]  ;;  %v725_v44 = vrot.slane %v580_v36, 1  ;;  %v747_v22 = vrot.slane %v595_v16, 1 }
  0x7e   : > { %1125 = vmatpush.msra.mxu2 %v294_v40  ;;  %1043 = vmatpush.msra.mxu0 %v262_v54  ;;  %v718_v40 = vsel %vm676_vm0, %v716_v25, %v717_v26  ;;  %v726_v45 = vrot.slane %v584_v37, 1  ;;  %v1247_v23 = vld [vmem:[#allocation2 + $0x478] sm:$0xff]  ;;  %v1278_v25 = vld [vmem:[#allocation2 + $0x570] sm:$0xff] }
  0x7f   : > { %1166 = vmatpush.msra.mxu3 %v310_v41  ;;  %1084 = vmatpush.msra.mxu1 %v278_v55  ;;  %v581_v41 = vld [vmem:[%s2779_s11 + $0x108] sm:$0xfe]  ;;  %v599_v36 = vld [vmem:[%s2779_s11 + $0x198] sm:$0xfe]  ;;  %v603_v37 = vld [vmem:[%s2779_s11 + $0x1b8] sm:$0x1] }
  0x80   : > { %1126 = vmatpush.msra.mxu2 %v293_v56  ;;  %1044 = vmatpush.msra.mxu0 %v261_v0  ;;  %v728_v53 = vrot.slane %v581_v41, 1  ;;  %v305_v55 = vld [vmem:[#allocation2 + $0x188] sm:$0xff]  ;;  %v727_v61 = vsel %vm676_vm0, %v725_v44, %v726_v45  ;;  %v592_v0 = vld [vmem:[%s2779_s11 + $0x160] sm:$0x1]  ;;  %v1294_v41 = vld [vmem:[#allocation2 + $0x5f0] sm:$0xff]  ;;  %v759_v49 = vrot.slane %v603_v37, 1 }
  0x81   : > { %889 = vmatmul.f32.gmra.mxu0 %v691_v42  ;;  %1167 = vmatpush.msra.mxu3 %v309_v63  ;;  %v585_v42 = vld [vmem:[%s2779_s11 + $0x128] sm:$0x1]  ;;  %v588_v63 = vld [vmem:[%s2779_s11 + $0x140] sm:$0xfe]  ;;  %v738_v9 = vrot.slane %v592_v0, 1 }
  0x82   : > { %971 = vmatmul.f32.gmra.mxu2 %v697_v43  ;;  %1085 = vmatpush.msra.mxu1 %v277_v1  ;;  %v724_v43 = vsel %vm676_vm0, %v722_v30, %v723_v31  ;;  %v729_v54 = vrot.slane %v585_v42, 1  ;;  %v257_v56 = vld [vmem:[#allocation2 + $0x8] sm:$0xff]  ;;  %v304_v1 = vld [vmem:[#allocation2 + $0x180] sm:$0xff]  ;;  %v737_v8 = vrot.slane %v588_v63, 1  ;;  %v602_v30 = vld [vmem:[%s2779_s11 + $0x1b0] sm:$0x1] }
  0x83   : > { %930 = vmatmul.f32.gmra.mxu1 %v694_v48  ;;  %1127 = vmatpush.msra.mxu2 %v292_v4  ;;  %v289_v48 = vld [vmem:[#allocation2 + $0x108] sm:$0xff]  ;;  %v1246_v42 = vld [vmem:[#allocation2 + $0x470] sm:$0xff]  ;;  %v607_v3 = vld [vmem:[%s2779_s11 + $0x1d8] sm:$0xfe] }
  0x84   : > { %1012 = vmatmul.f32.gmra.mxu3 %v700_v51  ;;  %1045 = vmatpush.msra.mxu0 %v260_v18  ;;  %v583_v51 = vld [vmem:[%s2779_s11 + $0x118] sm:$0xfe]  ;;  %v730_v4 = vsel %vm676_vm0, %v728_v53, %v729_v54  ;;  %v741_v18 = vrot.slane %v593_v10, 1  ;;  %v739_v26 = vsel %vm676_vm0, %v737_v8, %v738_v9  ;;  %v1277_v44 = vld [vmem:[#allocation2 + $0x568] sm:$0xff]  ;;  %v1244_v8 = vld [vmem:[#allocation2 + $0x460] sm:$0xff]  ;;  %v770_v10 = vrot.slane %v607_v3, 1 }
  0x85   : > { %1168 = vmatpush.msra.mxu3 %v308_v5  ;;  %1086 = vmatpush.msra.mxu1 %v276_v19  ;;  %v734_v58 = vrot.slane %v583_v51, 1  ;;  %v589_v5 = vld [vmem:[%s2779_s11 + $0x148] sm:$0xfe]  ;;  %v596_v19 = vld [vmem:[%s2779_s11 + $0x180] sm:$0xfe] }
  0x86   : > { %1128 = vmatpush.msra.mxu2 %v291_v20  ;;  %1046 = vmatpush.msra.mxu0 %v259_v28  ;;  %v740_v17 = vrot.slane %v589_v5, 1  ;;  %v1295_v20 = vld [vmem:[#allocation2 + $0x5f8] sm:$0xff]  ;;  %v600_v28 = vld [vmem:[%s2779_s11 + $0x1a0] sm:$0x1]  ;;  %v1261_v51 = vld [vmem:[#allocation2 + $0x4e8] sm:$0xff] }
  0x87   : > { %1169 = vmatpush.msra.mxu3 %v307_v27  ;;  %1087 = vmatpush.msra.mxu1 %v275_v29  ;;  %v745_v27 = vsel %vm676_vm0, %v743_v13, %v744_v14  ;;  %v598_v29 = vld [vmem:[%s2779_s11 + $0x190] sm:$0xfe]  ;;  %v750_v38 = vrot.slane %v600_v28, 1  ;;  %v605_v63 = vld [vmem:[%s2779_s11 + $0x1c8] sm:$0xfe]  ;;  %v1260_v9 = vld [vmem:[#allocation2 + $0x4e0] sm:$0xff] }
  0x88   : > { %1129 = vmatpush.msra.mxu2 %v290_v32  ;;  %1047 = vmatpush.msra.mxu0 %v258_v46  ;;  %v742_v31 = vsel %vm676_vm0, %v740_v17, %v741_v18  ;;  %v749_v32 = vrot.slane %v596_v19, 1  ;;  %v755_v39 = vrot.slane %v598_v29, 1  ;;  %v609_v0 = vld [vmem:[%s2779_s11 + $0x1e8] sm:$0x1]  ;;  %v764_v5 = vrot.slane %v605_v63, 1  ;;  %v1291_v13 = vld [vmem:[#allocation2 + $0x5d8] sm:$0xff] }
  0x89   : > { %892 = vmatmul.f32.gmra.mxu0 %v703_v6  ;;  %1170 = vmatpush.msra.mxu3 %v306_v33  ;;  %v256_v6 = vld [vmem:[#allocation2] sm:$0xff]  ;;  %v597_v33 = vld [vmem:[%s2779_s11 + $0x188] sm:$0xfe]  ;;  %v1243_v14 = vld [vmem:[#allocation2 + $0x458] sm:$0xff] }
  0x8a   : > { %974 = vmatmul.f32.gmra.mxu2 %v709_v7  ;;  %1088 = vmatpush.msra.mxu1 %v274_v47  ;;  %v736_v7 = vsel %vm676_vm0, %v734_v58, %v735_v59  ;;  %v752_v45 = vrot.slane %v597_v33, 1  ;;  %v1293_v47 = vld [vmem:[#allocation2 + $0x5e8] sm:$0xff]  ;;  %v751_v53 = vsel %vm676_vm0, %v749_v32, %v750_v38  ;;  %v610_v58 = vld [vmem:[%s2779_s11 + $0x1f0] sm:$0x1]  ;;  %v1259_v17 = vld [vmem:[#allocation2 + $0x4d8] sm:$0xff] }
  0x8b   : > { %933 = vmatmul.f32.gmra.mxu1 %v706_v12  ;;  %1130 = vmatpush.msra.mxu2 %v289_v48  ;;  %v1279_v12 = vld [vmem:[#allocation2 + $0x578] sm:$0xff]  ;;  %v758_v48 = vrot.slane %v599_v36, 1  ;;  %v768_v2 = vrot.slane %v610_v58, 1  ;;  %v1274_v18 = vld [vmem:[#allocation2 + $0x550] sm:$0xff]  ;;  %v1257_v28 = vld [vmem:[#allocation2 + $0x4c8] sm:$0xff] }
  0x8c   : > { %1015 = vmatmul.f32.gmra.mxu3 %v712_v15  ;;  %1048 = vmatpush.msra.mxu0 %v257_v56  ;;  %v591_v15 = vld [vmem:[%s2779_s11 + $0x158] sm:$0xfe]  ;;  %v608_v56 = vld [vmem:[%s2779_s11 + $0x1e0] sm:$0x1]  ;;  %v2346_v33 = vld [vmem:[%s2779_s11 + $0x10] sm:$0xff] }
  0x8d   : > { %1171 = vmatpush.msra.mxu3 %v305_v55  ;;  %1089 = vmatpush.msra.mxu1 %v273_v57  ;;  %v746_v21 = vrot.slane %v591_v15, 1  ;;  %v604_v55 = vld [vmem:[%s2779_s11 + $0x1c0] sm:$0xfe]  ;;  %v606_v57 = vld [vmem:[%s2779_s11 + $0x1d0] sm:$0xfe] }
  0x8e   : > { %1131 = vmatpush.msra.mxu2 %v288_v60  ;;  %1049 = vmatpush.msra.mxu0 %v256_v6  ;;  %v760_v60 = vsel %vm676_vm0, %v758_v48, %v759_v49  ;;  %v765_v6 = vrot.slane %v609_v0, 1  ;;  %v1272_v29 = vld [vmem:[#allocation2 + $0x540] sm:$0xff]  ;;  %v1254_v58 = vld [vmem:[#allocation2 + $0x4b0] sm:$0xff]  ;;  %v1253_v0 = vld [vmem:[#allocation2 + $0x4a8] sm:$0xff] }
  0x8f   : > { %1172 = vmatpush.msra.mxu3 %v304_v1  ;;  %1090 = vmatpush.msra.mxu1 %v272_v11  ;;  %v767_v1 = vrot.slane %v606_v57, 1  ;;  %v2345_v32 = vld [vmem:[%s2779_s11] sm:$0xff]  ;;  %v1238_v57 = vld [vmem:[#allocation2 + $0x430] sm:$0xff] }
  0x90   : > { %1378 = vmatpush.msrb.mxu2 %v1279_v12  ;;  %1296 = vmatpush.msrb.mxu0 %v1247_v23  ;;  %v1275_v12 = vld [vmem:[#allocation2 + $0x558] sm:$0xff]  ;;  %v766_v19 = vsel %vm676_vm0, %v764_v5, %v765_v6  ;;  %v1258_v23 = vld [vmem:[#allocation2 + $0x4d0] sm:$0xff]  ;;  %v1288_v37 = vld [vmem:[#allocation2 + $0x5c0] sm:$0xff] }
  0x91   : > { %895 = vmatmul.f32.gmra.mxu0 %v715_v34  ;;  %1419 = vmatpush.msrb.mxu3 %v1295_v20  ;;  %v748_v34 = vsel %vm676_vm0, %v746_v21, %v747_v22  ;;  %v769_v16 = vsel %vm676_vm0, %v767_v1, %v768_v2  ;;  %v1290_v21 = vld [vmem:[#allocation2 + $0x5d0] sm:$0xff]  ;;  %v1240_v38 = vld [vmem:[#allocation2 + $0x440] sm:$0xff] }
  0x92   : > { %977 = vmatmul.f32.gmra.mxu2 %v721_v35  ;;  %1337 = vmatpush.msrb.mxu1 %v1263_v24  ;;  %v601_v35 = vld [vmem:[%s2779_s11 + $0x1a8] sm:$0x1]  ;;  %v1242_v22 = vld [vmem:[#allocation2 + $0x450] sm:$0xff]  ;;  %v1268_v1 = vld [vmem:[#allocation2 + $0x520] sm:$0xff] }
  0x93   : > { %936 = vmatmul.f32.gmra.mxu1 %v718_v40  ;;  %1379 = vmatpush.msrb.mxu2 %v1278_v25  ;;  %v756_v40 = vrot.slane %v602_v30, 1  ;;  %v753_v46 = vrot.slane %v601_v35, 1  ;;  %v1273_v24 = vld [vmem:[#allocation2 + $0x548] sm:$0xff]  ;;  %v2348_v35 = vld [vmem:[%s2779_s11 + $0x18] sm:$0xff]  ;;  %v2353_v6 = vld [vmem:[%s2779_s11 + $0x80] sm:$0xff] }
  0x94   : > { %1018 = vmatmul.f32.gmra.mxu3 %v724_v43  ;;  %v1262_v43 = vld [vmem:[#allocation2 + $0x4f0] sm:$0xff]  ;;  %1297 = vmatpush.msrb.mxu0 %v1246_v42  ;;  %v1289_v25 = vld [vmem:[#allocation2 + $0x5c8] sm:$0xff]  ;;  %v1287_v42 = vld [vmem:[#allocation2 + $0x5b8] sm:$0xff] }
  0x95   : > { %1420 = vmatpush.msrb.mxu3 %v1294_v41  ;;  %1338 = vmatpush.msrb.mxu1 %v1262_v43  ;;  %v757_v54 = vsel %vm676_vm0, %v755_v39, %v756_v40  ;;  %v754_v59 = vsel %vm676_vm0, %v752_v45, %v753_v46  ;;  %v1256_v39 = vld [vmem:[#allocation2 + $0x4c0] sm:$0xff]  ;;  %v1271_v41 = vld [vmem:[#allocation2 + $0x538] sm:$0xff]  ;;  %v1270_v46 = vld [vmem:[#allocation2 + $0x530] sm:$0xff] }
  0x96   : > { %1380 = vmatpush.msrb.mxu2 %v1277_v44  ;;  %1298 = vmatpush.msrb.mxu0 %v1245_v50  ;;  %v1239_v43 = vld [vmem:[#allocation2 + $0x438] sm:$0xff] }
  0x97   : > { %1421 = vmatpush.msrb.mxu3 %v1293_v47  ;;  %1339 = vmatpush.msrb.mxu1 %v1261_v51  ;;  %v1255_v45 = vld [vmem:[#allocation2 + $0x4b8] sm:$0xff]  ;;  %v2349_v51 = vld [vmem:[%s2779_s11 + $0x40] sm:$0xff] }
  0x98   : > { %1381 = vmatpush.msrb.mxu2 %v1276_v52  ;;  %1299 = vmatpush.msrb.mxu0 %v1244_v8  ;;  %v2350_v52 = vld [vmem:[%s2779_s11 + $0x50] sm:$0xff]  ;;  %v2355_v8 = vld [vmem:[%s2779_s11 + $0x88] sm:$0xff] }
  0x99   : > { %898 = vmatmul.f32.gmra.mxu0 %v727_v61  ;;  %v761_v61 = vrot.slane %v604_v55, 1  ;;  %1340 = vmatpush.msrb.mxu1 %v1260_v9  ;;  %v2356_v9 = vld [vmem:[%s2779_s11 + $0x98] sm:$0xff] }
  0x9a   : > { %980 = vmatmul.f32.gmra.mxu2 %v733_v62  ;;  %v762_v62 = vrot.slane %v608_v56, 1  ;;  %1300 = vmatpush.msrb.mxu0 %v1243_v14  ;;  %v1286_v56 = vld [vmem:[#allocation2 + $0x5b0] sm:$0xff] }
  0x9b   : > { %939 = vmatmul.f32.gmra.mxu1 %v730_v4  ;;  %v611_v4 = vld [vmem:[%s2779_s11 + $0x1f8] sm:$0x1]  ;;  %1382 = vmatpush.msrb.mxu2 %v1275_v12  ;;  %v1236_v12 = vld [vmem:[#allocation2 + $0x420] sm:$0xff] }
  0x9c   : > { %1021 = vmatmul.f32.gmra.mxu3 %v736_v7  ;;  %v1292_v7 = vld [vmem:[#allocation2 + $0x5e0] sm:$0xff]  ;;  %v771_v11 = vrot.slane %v611_v4, 1  ;;  %v763_v15 = vsel %vm676_vm0, %v761_v61, %v762_v62  ;;  %1341 = vmatpush.msrb.mxu1 %v1259_v17  ;;  %v1285_v61 = vld [vmem:[#allocation2 + $0x5a8] sm:$0xff]  ;;  %v1235_v17 = vld [vmem:[#allocation2 + $0x418] sm:$0xff] }
  0x9d   : > { %1422 = vmatpush.msrb.mxu3 %v1292_v7  ;;  %1383 = vmatpush.msrb.mxu2 %v1274_v18  ;;  %v1237_v62 = vld [vmem:[#allocation2 + $0x428] sm:$0xff]  ;;  %v2354_v7 = vld [vmem:[%s2779_s11 + $0x90] sm:$0xff] }
  0x9e   : > { %v772_v20 = vsel %vm676_vm0, %v770_v10, %v771_v11  ;;  %1301 = vmatpush.msrb.mxu0 %v1242_v22  ;;  %1342 = vmatpush.msrb.mxu1 %v1258_v23  ;;  %v1284_v11 = vld [vmem:[#allocation2 + $0x5a0] sm:$0xff] }
  0x9f   : > { %1423 = vmatpush.msrb.mxu3 %v1291_v13  ;;  %1384 = vmatpush.msrb.mxu2 %v1273_v24  ;;  %v1252_v13 = vld [vmem:[#allocation2 + $0x4a0] sm:$0xff] }
  0xa0   : > { %1343 = vmatpush.msrb.mxu1 %v1257_v28  ;;  %v2360_v28 = vld [vmem:[%s2779_s11 + $0xd8] sm:$0xff] }
  0xa1   : > { %901 = vmatmul.f32.gmra.mxu0 %v739_v26  ;;  %1424 = vmatpush.msrb.mxu3 %v1290_v21  ;;  %v1241_v26 = vld [vmem:[#allocation2 + $0x448] sm:$0xff] }
  0xa2   : > { %983 = vmatmul.f32.gmra.mxu2 %v745_v27  ;;  %1302 = vmatpush.msrb.mxu0 %v1241_v26  ;;  %v2358_v26 = vld [vmem:[%s2779_s11 + $0xd0] sm:$0xff] }
  0xa3   : > { %942 = vmatmul.f32.gmra.mxu1 %v742_v31  ;;  %1425 = vmatpush.msrb.mxu3 %v1289_v25  ;;  %v2357_v25 = vld [vmem:[%s2779_s11 + $0xc0] sm:$0xff] }
  0xa4   : > { %1024 = vmatmul.f32.gmra.mxu3 %v748_v34  ;;  %1385 = vmatpush.msrb.mxu2 %v1272_v29  ;;  %v2347_v34 = vld [vmem:[%s2779_s11 + $0x8] sm:$0xff] }
  0xa5   : > { %1426 = vmatpush.msrb.mxu3 %v1288_v37  ;;  %1303 = vmatpush.msrb.mxu0 %v1240_v38  ;;  %v1249_v38 = vld [vmem:[#allocation2 + $0x488] sm:$0xff] }
  0xa6   : > { %1344 = vmatpush.msrb.mxu1 %v1256_v39  ;;  %1386 = vmatpush.msrb.mxu2 %v1271_v41  ;;  %v1264_v39 = vld [vmem:[#allocation2 + $0x500] sm:$0xff] }
  0xa7   : > { %1427 = vmatpush.msrb.mxu3 %v1287_v42  ;;  %1304 = vmatpush.msrb.mxu0 %v1239_v43 }
  0xa8   : > { %1345 = vmatpush.msrb.mxu1 %v1255_v45  ;;  %1387 = vmatpush.msrb.mxu2 %v1270_v46  ;;  %v2362_v45 = vld [vmem:[%s2779_s11 + $0x110] sm:$0xff]  ;;  %v1280_v46 = vld [vmem:[#allocation2 + $0x580] sm:$0xff] }
  0xa9   : > { %904 = vmatmul.f32.gmra.mxu0 %v751_v53  ;;  %v2351_v53 = vld [vmem:[%s2779_s11 + $0x48] sm:$0xff]  ;;  %1428 = vmatpush.msrb.mxu3 %v1286_v56  ;;  %v1788_v56 = vld [vmem:[#allocation2 + $0x7f8] sm:$0xff] }
  0xaa   : > { %986 = vmatmul.f32.gmra.mxu2 %v757_v54  ;;  %v2352_v54 = vld [vmem:[%s2779_s11 + $0x58] sm:$0xff]  ;;  %1305 = vmatpush.msrb.mxu0 %v1238_v57 }
  0xab   : > { %945 = vmatmul.f32.gmra.mxu1 %v754_v59  ;;  %1429 = vmatpush.msrb.mxu3 %v1285_v61  ;;  %v1740_v57 = vld [vmem:[#allocation2 + $0x678] sm:$0xff] }
  0xac   : > { %1027 = vmatmul.f32.gmra.mxu3 %v760_v60  ;;  %v1269_v60 = vld [vmem:[#allocation2 + $0x528] sm:$0xff]  ;;  %1346 = vmatpush.msrb.mxu1 %v1254_v58 }
  0xad   : > { %1388 = vmatpush.msrb.mxu2 %v1269_v60  ;;  %1306 = vmatpush.msrb.mxu0 %v1237_v62  ;;  %v1771_v60 = vld [vmem:[#allocation2 + $0x770] sm:$0xff] }
  0xae   : > { %1347 = vmatpush.msrb.mxu1 %v1253_v0  ;;  %1430 = vmatpush.msrb.mxu3 %v1284_v11 }
  0xaf   : > { %1389 = vmatpush.msrb.mxu2 %v1268_v1  ;;  %1307 = vmatpush.msrb.mxu0 %v1236_v12  ;;  %v2365_v1 = vld [vmem:[%s2779_s11 + $0x140] sm:$0xff]  ;;  %v1738_v12 = vld [vmem:[#allocation2 + $0x668] sm:$0xff] }
  0xb0   : > { %1348 = vmatpush.msrb.mxu1 %v1252_v13 }
  0xb1   : > { %907 = vmatmul.f32.gmra.mxu0 %v763_v15  ;;  %v1267_v15 = vld [vmem:[#allocation2 + $0x518] sm:$0xff] }
  0xb2   : > { %989 = vmatmul.f32.gmra.mxu2 %v769_v16  ;;  %v1283_v16 = vld [vmem:[#allocation2 + $0x598] sm:$0xff]  ;;  %1308 = vmatpush.msrb.mxu0 %v1235_v17 }
  0xb3   : > { %948 = vmatmul.f32.gmra.mxu1 %v766_v19  ;;  %1390 = vmatpush.msrb.mxu2 %v1267_v15  ;;  %v1251_v19 = vld [vmem:[#allocation2 + $0x498] sm:$0xff]  ;;  %v1769_v15 = vld [vmem:[#allocation2 + $0x760] sm:$0xff] }
  0xb4   : > { %1030 = vmatmul.f32.gmra.mxu3 %v772_v20  ;;  %v1266_v20 = vld [vmem:[#allocation2 + $0x510] sm:$0xff]  ;;  %1349 = vmatpush.msrb.mxu1 %v1251_v19  ;;  %v1785_v19 = vld [vmem:[#allocation2 + $0x7e0] sm:$0xff] }
  0xb5   : > { %1431 = vmatpush.msrb.mxu3 %v1283_v16  ;;  %1391 = vmatpush.msrb.mxu2 %v1266_v20 }
  0xb6   : > { %v401_v27 = vpop.f32.mrf.mxu0 }
  0xb8   : > { %v442_v30 = vpop.f32.mrf.mxu1 }
  0xb9   : > { %v443_v31 = vadd.f32 %v442_v30, %v401_v27  ;;  %1050 = vmatmul.f32.vlgmr.msra.gmra.mxu0 %v2345_v32  ;;  %v2359_v27 = vld [vmem:[%s2779_s11 + $0xc8] sm:$0xff]  ;;  %v1282_v30 = vld [vmem:[#allocation2 + $0x590] sm:$0xff] }
  0xba   : > { %1132 = vmatmul.f32.vlgmr.msra.gmra.mxu2 %v2346_v33  ;;  %v1250_v32 = vld [vmem:[#allocation2 + $0x490] sm:$0xff]  ;;  %1432 = vmatpush.msrb.mxu3 %v1282_v30 }
  0xbb   : > { %1091 = vmatmul.f32.vlgmr.msra.gmra.mxu1 %v2347_v34  ;;  %v1265_v34 = vld [vmem:[#allocation2 + $0x508] sm:$0xff] }
  0xbc   : > { %1173 = vmatmul.f32.vlgmr.msra.gmra.mxu3 %v2348_v35  ;;  %v483_v36 = vpop.f32.mrf.mxu2  ;;  %v1281_v35 = vld [vmem:[#allocation2 + $0x588] sm:$0xff]  ;;  %1350 = vmatpush.msrb.mxu1 %v1250_v32 }
  0xbd   : > { %v484_v40 = vadd.f32 %v483_v36, %v443_v31  ;;  %v1234_v31 = vld [vmem:[#allocation2 + $0x410] sm:$0xff]  ;;  %v1233_v36 = vld [vmem:[#allocation2 + $0x408] sm:$0xff]  ;;  %1392 = vmatpush.msrb.mxu2 %v1265_v34  ;;  %1433 = vmatpush.msrb.mxu3 %v1281_v35 }
  0xbe   : > { %v404_v44 = vpop.f32.mrf.mxu0  ;;  %1309 = vmatpush.msrb.mxu0 %v1234_v31  ;;  %1351 = vmatpush.msrb.mxu1 %v1249_v38  ;;  %v1784_v31 = vld [vmem:[#allocation2 + $0x7d8] sm:$0xff] }
  0xbf   : > { %v524_v47 = vpop.f32.mrf.mxu3  ;;  %1393 = vmatpush.msrb.mxu2 %v1264_v39  ;;  %1434 = vmatpush.msrb.mxu3 %v1280_v46  ;;  %v1752_v38 = vld [vmem:[#allocation2 + $0x6d8] sm:$0xff]  ;;  %v1767_v39 = vld [vmem:[#allocation2 + $0x750] sm:$0xff] }
  0xc0   : > { %v2935_v48 = vadd.f32 %v524_v47, %v484_v40  ;;  %v445_v49 = vpop.f32.mrf.mxu1  ;;  %1310 = vmatpush.msrb.mxu0 %v1233_v36  ;;  %v2363_v47 = vld [vmem:[%s2779_s11 + $0x108] sm:$0xff] }
  0xc1   : > { %v446_v50 = vadd.f32 %v445_v49, %v404_v44  ;;  %1053 = vmatmul.f32.gmra.mxu0 %v2349_v51  ;;  %v2361_v44 = vld [vmem:[%s2779_s11 + $0x100] sm:$0xff]  ;;  %v2364_v49 = vld [vmem:[%s2779_s11 + $0x118] sm:$0xff]  ;;  %1912 = vmatpush.msra.mxu3 %v1788_v56 }
  0xc2   : > { %1135 = vmatmul.f32.gmra.mxu2 %v2350_v52  ;;  %1962 = vst [vmem:[%s2939_s9 + $0x8] sm:$0xff] %v2935_v48  ;;  %v1232_v51 = vld [vmem:[#allocation2 + $0x400] sm:$0xff]  ;;  %v2006_v34 = vmul.f32 %v2935_v48, %v2935_v48 }
  0xc3   : > { %1094 = vmatmul.f32.gmra.mxu1 %v2351_v53  ;;  %v1248_v52 = vld [vmem:[#allocation2 + $0x480] sm:$0xff]  ;;  %1311 = vmatpush.msrb.mxu0 %v1232_v51  ;;  %v1751_v51 = vld [vmem:[#allocation2 + $0x6d0] sm:$0xff] }
  0xc4   : > { %1176 = vmatmul.f32.gmra.mxu3 %v2352_v54  ;;  %v486_v55 = vpop.f32.mrf.mxu2  ;;  %1352 = vmatpush.msrb.mxu1 %v1248_v52 }
  0xc5   : > { %v487_v59 = vadd.f32 %v486_v55, %v446_v50  ;;  %v1772_v55 = vld [vmem:[#allocation2 + $0x778] sm:$0xff]  ;;  %1789 = vmatpush.msra.mxu0 %v1740_v57 }
  0xc6   : > { %v407_v63 = vpop.f32.mrf.mxu0  ;;  %1871 = vmatpush.msra.mxu2 %v1772_v55  ;;  %v2375_v55 = vld [vmem:[%s2779_s11 + $0x1c8] sm:$0xff] }
  0xc7   : > { %v527_v2 = vpop.f32.mrf.mxu3 }
  0xc8   : > { %v2945_v3 = vadd.f32 %v527_v2, %v487_v59  ;;  %v448_v4 = vpop.f32.mrf.mxu1  ;;  %v1756_v59 = vld [vmem:[#allocation2 + $0x6f8] sm:$0xff]  ;;  %v2366_v2 = vld [vmem:[%s2779_s11 + $0x150] sm:$0xff]  ;;  %1872 = vmatpush.msra.mxu2 %v1771_v60  ;;  %v1782_v60 = vld [vmem:[#allocation2 + $0x7c8] sm:$0xff] }
  0xc9   : > { %v449_v5 = vadd.f32 %v448_v4, %v407_v63  ;;  %1056 = vmatmul.f32.gmra.mxu0 %v2353_v6  ;;  %1830 = vmatpush.msra.mxu1 %v1756_v59  ;;  %v1787_v63 = vld [vmem:[#allocation2 + $0x7f0] sm:$0xff]  ;;  %v1770_v6 = vld [vmem:[#allocation2 + $0x768] sm:$0xff] }
  0xca   : > { %1138 = vmatmul.f32.gmra.mxu2 %v2354_v7  ;;  %1964 = vst [vmem:[%s2939_s9 + $0x18] sm:$0xff] %v2945_v3  ;;  %v1739_v4 = vld [vmem:[#allocation2 + $0x670] sm:$0xff]  ;;  %1913 = vmatpush.msra.mxu3 %v1787_v63  ;;  %v2367_v7 = vld [vmem:[%s2779_s11 + $0x148] sm:$0xff]  ;;  %v1984_v35 = vadd.f32 %v2945_v3, %v2935_v48 }
  0xcb   : > { %1097 = vmatmul.f32.gmra.mxu1 %v2355_v8  ;;  %1790 = vmatpush.msra.mxu0 %v1739_v4  ;;  %v2368_v8 = vld [vmem:[%s2779_s11 + $0x158] sm:$0xff]  ;;  %v2181_v63 = vld [vmem:[%s2779_s11 + $0x50] sm:$0xff] }
  0xcc   : > { %1179 = vmatmul.f32.gmra.mxu3 %v2356_v9  ;;  %v489_v10 = vpop.f32.mrf.mxu2  ;;  %1873 = vmatpush.msra.mxu2 %v1770_v6  ;;  %v1750_v6 = vld [vmem:[#allocation2 + $0x6c8] sm:$0xff] }
  0xcd   : > { %v490_v14 = vadd.f32 %v489_v10, %v449_v5  ;;  %v1755_v5 = vld [vmem:[#allocation2 + $0x6f0] sm:$0xff]  ;;  %v1786_v10 = vld [vmem:[#allocation2 + $0x7e8] sm:$0xff]  ;;  %1791 = vmatpush.msra.mxu0 %v1738_v12 }
  0xce   : > { %v410_v18 = vpop.f32.mrf.mxu0  ;;  %1831 = vmatpush.msra.mxu1 %v1755_v5  ;;  %1914 = vmatpush.msra.mxu3 %v1786_v10  ;;  %v2179_v5 = vld [vmem:[%s2779_s11 + $0x40] sm:$0xff] }
  0xcf   : > { %v530_v21 = vpop.f32.mrf.mxu3  ;;  %1874 = vmatpush.msra.mxu2 %v1769_v15 }
  0xd0   : > { %v2953_v22 = vadd.f32 %v530_v21, %v490_v14  ;;  %v451_v23 = vpop.f32.mrf.mxu1  ;;  %v1754_v14 = vld [vmem:[#allocation2 + $0x6e8] sm:$0xff]  ;;  %v2369_v21 = vld [vmem:[%s2779_s11 + $0x180] sm:$0xff]  ;;  %1915 = vmatpush.msra.mxu3 %v1785_v19 }
  0xd1   : > { %v452_v24 = vadd.f32 %v451_v23, %v410_v18  ;;  %1059 = vmatmul.f32.gmra.mxu0 %v2357_v25  ;;  %1832 = vmatpush.msra.mxu1 %v1754_v14  ;;  %v2370_v23 = vld [vmem:[%s2779_s11 + $0x190] sm:$0xff]  ;;  %v1753_v25 = vld [vmem:[#allocation2 + $0x6e0] sm:$0xff] }
  0xd2   : > { %1141 = vmatmul.f32.gmra.mxu2 %v2358_v26  ;;  %1966 = vst [vmem:[%s2939_s9 + $0x28] sm:$0xff] %v2953_v22  ;;  %v1768_v26 = vld [vmem:[#allocation2 + $0x758] sm:$0xff]  ;;  %1916 = vmatpush.msra.mxu3 %v1784_v31  ;;  %v2008_v36 = vmul.f32 %v2953_v22, %v2953_v22  ;;  %v1781_v14 = vld [vmem:[#allocation2 + $0x7c0] sm:$0xff] }
  0xd3   : > { %1100 = vmatmul.f32.gmra.mxu1 %v2359_v27  ;;  %v2371_v27 = vld [vmem:[%s2779_s11 + $0x188] sm:$0xff]  ;;  %1875 = vmatpush.msra.mxu2 %v1768_v26  ;;  %v1780_v26 = vld [vmem:[#allocation2 + $0x7b8] sm:$0xff]  ;;  %v2183_v31 = vld [vmem:[%s2779_s11 + $0x80] sm:$0xff] }
  0xd4   : > { %1182 = vmatmul.f32.gmra.mxu3 %v2360_v28  ;;  %v492_v29 = vpop.f32.mrf.mxu2  ;;  %v2007_v28 = vmul.f32 %v2945_v3, %v2945_v3  ;;  %1833 = vmatpush.msra.mxu1 %v1753_v25 }
  0xd5   : > { %v493_v33 = vadd.f32 %v492_v29, %v452_v24  ;;  %v1737_v24 = vld [vmem:[#allocation2 + $0x660] sm:$0xff]  ;;  %v2372_v29 = vld [vmem:[%s2779_s11 + $0x198] sm:$0xff]  ;;  %1876 = vmatpush.msra.mxu2 %v1767_v39 }
  0xd6   : > { %v413_v37 = vpop.f32.mrf.mxu0  ;;  %1792 = vmatpush.msra.mxu0 %v1737_v24  ;;  %1834 = vmatpush.msra.mxu1 %v1752_v38  ;;  %v1779_v38 = vld [vmem:[#allocation2 + $0x7b0] sm:$0xff] }
  0xd7   : > { %v533_v40 = vpop.f32.mrf.mxu3 }
  0xd8   : > { %v2961_v41 = vadd.f32 %v533_v40, %v493_v33  ;;  %v454_v42 = vpop.f32.mrf.mxu1  ;;  %v1736_v33 = vld [vmem:[#allocation2 + $0x658] sm:$0xff]  ;;  %1835 = vmatpush.msra.mxu1 %v1751_v51  ;;  %v1746_v51 = vld [vmem:[#allocation2 + $0x6a8] sm:$0xff] }
  0xd9   : > { %v455_v43 = vadd.f32 %v454_v42, %v413_v37  ;;  %1062 = vmatmul.f32.gmra.mxu0 %v2361_v44  ;;  %v2014_v42 = vadd.f32 %v2007_v28, %v2006_v34  ;;  %v2185_v28 = vld [vmem:[%s2779_s11 + $0x90] sm:$0xff] }
  0xda   : > { %1144 = vmatmul.f32.gmra.mxu2 %v2362_v45  ;;  %1968 = vst [vmem:[%s2939_s9 + $0x38] sm:$0xff] %v2961_v41  ;;  %1793 = vmatpush.msra.mxu0 %v1736_v33  ;;  %v2009_v44 = vmul.f32 %v2961_v41, %v2961_v41  ;;  %v1783_v45 = vld [vmem:[#allocation2 + $0x7d0] sm:$0xff] }
  0xdb   : > { %1103 = vmatmul.f32.gmra.mxu1 %v2363_v47  ;;  %v2373_v47 = vld [vmem:[%s2779_s11 + $0x1c0] sm:$0xff]  ;;  %v2015_v52 = vadd.f32 %v2014_v42, %v2008_v36  ;;  %1917 = vmatpush.msra.mxu3 %v1783_v45  ;;  %v1763_v33 = vld [vmem:[#allocation2 + $0x730] sm:$0xff] }
  0xdc   : > { %1185 = vmatmul.f32.gmra.mxu3 %v2364_v49  ;;  %v495_v50 = vpop.f32.mrf.mxu2  ;;  %v2374_v49 = vld [vmem:[%s2779_s11 + $0x1d0] sm:$0xff]  ;;  %1836 = vmatpush.msra.mxu1 %v1750_v6 }
  0xdd   : > { %v496_v53 = vadd.f32 %v495_v50, %v455_v43  ;;  %v1985_v43 = vadd.f32 %v1984_v35, %v2953_v22  ;;  %v1735_v50 = vld [vmem:[#allocation2 + $0x650] sm:$0xff]  ;;  %v2016_v56 = vadd.f32 %v2015_v52, %v2009_v44  ;;  %1918 = vmatpush.msra.mxu3 %v1782_v60  ;;  %v1762_v44 = vld [vmem:[#allocation2 + $0x728] sm:$0xff]  ;;  %v1761_v52 = vld [vmem:[#allocation2 + $0x720] sm:$0xff] }
  0xde   : > { %v416_v54 = vpop.f32.mrf.mxu0  ;;  %1794 = vmatpush.msra.mxu0 %v1735_v50  ;;  %v1731_v42 = vld [vmem:[#allocation2 + $0x630] sm:$0xff]  ;;  %v2187_v50 = vld [vmem:[%s2779_s11 + $0xc0] sm:$0xff]  ;;  %v1760_v60 = vld [vmem:[#allocation2 + $0x718] sm:$0xff] }
  0xdf   : > { %v536_v58 = vpop.f32.mrf.mxu3  ;;  %1919 = vmatpush.msra.mxu3 %v1781_v14  ;;  %v1759_v6 = vld [vmem:[#allocation2 + $0x710] sm:$0xff] }
  0xe0   : > { %v2969_v61 = vadd.f32 %v536_v58, %v496_v53  ;;  %v457_v62 = vpop.f32.mrf.mxu1  ;;  %v1986_v53 = vadd.f32 %v1985_v43, %v2961_v41  ;;  %v2376_v41 = vld [vmem:[%s2779_s11 + $0x1d8] sm:$0xff]  ;;  %v1747_v43 = vld [vmem:[#allocation2 + $0x6b0] sm:$0xff] }
  0xe1   : > { %v458_v0 = vadd.f32 %v457_v62, %v416_v54  ;;  %1065 = vmatmul.f32.gmra.mxu0 %v2365_v1  ;;  %v1766_v54 = vld [vmem:[#allocation2 + $0x748] sm:$0xff]  ;;  %1920 = vmatpush.msra.mxu3 %v1780_v26  ;;  %v1727_v14 = vld [vmem:[#allocation2 + $0x610] sm:$0xff]  ;;  %v1757_v26 = vld [vmem:[#allocation2 + $0x700] sm:$0xff] }
  0xe2   : > { %1147 = vmatmul.f32.gmra.mxu2 %v2366_v2  ;;  %1970 = vst [vmem:[%s2939_s9 + $0x48] sm:$0xff] %v2969_v61  ;;  %v2010_v22 = vmul.f32 %v2969_v61, %v2969_v61  ;;  %v1987_v57 = vadd.f32 %v1986_v53, %v2969_v61 }
  0xe3   : > { %1106 = vmatmul.f32.gmra.mxu1 %v2367_v7  ;;  %1877 = vmatpush.msra.mxu2 %v1766_v54  ;;  %v1765_v7 = vld [vmem:[#allocation2 + $0x740] sm:$0xff] }
  0xe4   : > { %1188 = vmatmul.f32.gmra.mxu3 %v2368_v8  ;;  %v498_v9 = vpop.f32.mrf.mxu2  ;;  %v2017_v1 = vadd.f32 %v2016_v56, %v2010_v22  ;;  %v1777_v56 = vld [vmem:[#allocation2 + $0x7a0] sm:$0xff] }
  0xe5   : > { %v499_v11 = vadd.f32 %v498_v9, %v458_v0  ;;  %v1734_v0 = vld [vmem:[#allocation2 + $0x648] sm:$0xff]  ;;  %1878 = vmatpush.msra.mxu2 %v1765_v7  ;;  %1921 = vmatpush.msra.mxu3 %v1779_v38 }
  0xe6   : > { %v419_v13 = vpop.f32.mrf.mxu0  ;;  %1795 = vmatpush.msra.mxu0 %v1734_v0 }
  0xe7   : > { %v539_v16 = vpop.f32.mrf.mxu3 }
  0xe8   : > { %v2977_v17 = vadd.f32 %v539_v16, %v499_v11  ;;  %v460_v18 = vpop.f32.mrf.mxu1  ;;  %v2182_v16 = vld [vmem:[%s2779_s11 + $0x58] sm:$0xff] }
  0xe9   : > { %v461_v20 = vadd.f32 %v460_v18, %v419_v13  ;;  %1068 = vmatmul.f32.gmra.mxu0 %v2369_v21  ;;  %v2180_v13 = vld [vmem:[%s2779_s11 + $0x48] sm:$0xff]  ;;  %v1749_v18 = vld [vmem:[#allocation2 + $0x6c0] sm:$0xff] }
  0xea   : > { %1150 = vmatmul.f32.gmra.mxu2 %v2370_v23  ;;  %1972 = vst [vmem:[%s2939_s9 + $0x58] sm:$0xff] %v2977_v17  ;;  %v2011_v58 = vmul.f32 %v2977_v17, %v2977_v17  ;;  %v1988_v2 = vadd.f32 %v1987_v57, %v2977_v17  ;;  %v1733_v17 = vld [vmem:[#allocation2 + $0x640] sm:$0xff]  ;;  %v1764_v23 = vld [vmem:[#allocation2 + $0x738] sm:$0xff]  ;;  %1837 = vmatpush.msra.mxu1 %v1749_v18  ;;  %v1774_v18 = vld [vmem:[#allocation2 + $0x788] sm:$0xff] }
  0xeb   : > { %1109 = vmatmul.f32.gmra.mxu1 %v2371_v27  ;;  %1796 = vmatpush.msra.mxu0 %v1733_v17 }
  0xec   : > { %1191 = vmatmul.f32.gmra.mxu3 %v2372_v29  ;;  %v2018_v9 = vadd.f32 %v2017_v1, %v2011_v58  ;;  %1879 = vmatpush.msra.mxu2 %v1764_v23  ;;  %v1732_v29 = vld [vmem:[#allocation2 + $0x638] sm:$0xff]  ;;  %v2193_v1 = vld [vmem:[%s2779_s11 + $0x110] sm:$0xff] }
  0xed   : > { %v501_v30 = vpop.f32.mrf.mxu2  ;;  %1797 = vmatpush.msra.mxu0 %v1732_v29  ;;  %v2190_v58 = vld [vmem:[%s2779_s11 + $0xd8] sm:$0xff] }
  0xee   : > { %v502_v32 = vadd.f32 %v501_v30, %v461_v20  ;;  %v422_v37 = vpop.f32.mrf.mxu0  ;;  %1880 = vmatpush.msra.mxu2 %v1763_v33  ;;  %v2198_v33 = vld [vmem:[%s2779_s11 + $0x158] sm:$0xff] }
  0xef   : > { %v542_v40 = vpop.f32.mrf.mxu3  ;;  %1798 = vmatpush.msra.mxu0 %v1731_v42  ;;  %v2199_v42 = vld [vmem:[%s2779_s11 + $0x180] sm:$0xff] }
  0xf0   : > { %v543_v48 = vadd.f32 %v542_v40, %v502_v32  ;;  %v463_v3 = vpop.f32.mrf.mxu1  ;;  %v1748_v32 = vld [vmem:[#allocation2 + $0x6b8] sm:$0xff]  ;;  %1881 = vmatpush.msra.mxu2 %v1762_v44 }
  0xf1   : > { %v464_v46 = vadd.f32 %v463_v3, %v422_v37  ;;  %1071 = vmatmul.f32.gmra.mxu0 %v2373_v47  ;;  %1838 = vmatpush.msra.mxu1 %v1748_v32  ;;  %v2184_v37 = vld [vmem:[%s2779_s11 + $0x88] sm:$0xff]  ;;  %v2186_v40 = vld [vmem:[%s2779_s11 + $0x98] sm:$0xff] }
  0xf2   : > { %1153 = vmatmul.f32.gmra.mxu2 %v2374_v49  ;;  %1974 = vst [vmem:[%s2939_s9 + $0x68] sm:$0xff] %v543_v48  ;;  %v2012_v4 = vmul.f32 %v543_v48, %v543_v48  ;;  %v1989_v10 = vadd.f32 %v1988_v2, %v543_v48  ;;  %v1778_v3 = vld [vmem:[#allocation2 + $0x7a8] sm:$0xff]  ;;  %v1728_v2 = vld [vmem:[#allocation2 + $0x618] sm:$0xff] }
  0xf3   : > { %1112 = vmatmul.f32.gmra.mxu1 %v2375_v55  ;;  %1922 = vmatpush.msra.mxu3 %v1778_v3  ;;  %v1730_v47 = vld [vmem:[#allocation2 + $0x628] sm:$0xff] }
  0xf4   : > { %1194 = vmatmul.f32.gmra.mxu3 %v2376_v41  ;;  %v2019_v19 = vadd.f32 %v2018_v9, %v2012_v4  ;;  %1839 = vmatpush.msra.mxu1 %v1747_v43  ;;  %v2188_v55 = vld [vmem:[%s2779_s11 + $0xc8] sm:$0xff]  ;;  %v1729_v41 = vld [vmem:[#allocation2 + $0x620] sm:$0xff] }
  0xf5   : > { %v504_v59 = vpop.f32.mrf.mxu2  ;;  %1799 = vmatpush.msra.mxu0 %v1730_v47  ;;  %1882 = vmatpush.msra.mxu2 %v1761_v52  ;;  %v2200_v3 = vld [vmem:[%s2779_s11 + $0x188] sm:$0xff]  ;;  %v2203_v52 = vld [vmem:[%s2779_s11 + $0x1c0] sm:$0xff] }
  0xf6   : > { %v505_v62 = vadd.f32 %v504_v59, %v464_v46  ;;  %v887_v61 = vpop.f32.mrf.mxu0  ;;  %v2189_v46 = vld [vmem:[%s2779_s11 + $0xd0] sm:$0xff]  ;;  %1840 = vmatpush.msra.mxu1 %v1746_v51  ;;  %v1745_v59 = vld [vmem:[#allocation2 + $0x6a0] sm:$0xff]  ;;  %1923 = vmatpush.msra.mxu3 %v1777_v56  ;;  %v2204_v56 = vld [vmem:[%s2779_s11 + $0x1c8] sm:$0xff] }
  0xf7   : > { %v545_v8 = vpop.f32.mrf.mxu3  ;;  %1800 = vmatpush.msra.mxu0 %v1729_v41  ;;  %1883 = vmatpush.msra.mxu2 %v1760_v60  ;;  %v2205_v51 = vld [vmem:[%s2779_s11 + $0x1d0] sm:$0xff] }
  0xf8   : > { %v546_v11 = vadd.f32 %v545_v8, %v505_v62  ;;  %v928_v12 = vpop.f32.mrf.mxu1  ;;  %1841 = vmatpush.msra.mxu1 %v1745_v59  ;;  %v2209_v60 = vld [vmem:[%s2779_s11 + $0x210] sm:$0xff] }
  0xf9   : > { %v929_v15 = vadd.f32 %v928_v12, %v887_v61  ;;  %1312 = vmatmul.f32.vlgmr.msrb.gmra.mxu0 %v2179_v5  ;;  %v2191_v61 = vld [vmem:[%s2779_s11 + $0x100] sm:$0xff]  ;;  %v1744_v5 = vld [vmem:[#allocation2 + $0x698] sm:$0xff]  ;;  %1884 = vmatpush.msra.mxu2 %v1759_v6 }
  0xfa   : > { %1394 = vmatmul.f32.vlgmr.msrb.gmra.mxu2 %v2181_v63  ;;  %1976 = vst [vmem:[%s2939_s9 + $0x78] sm:$0xff] %v546_v11  ;;  %v1990_v20 = vadd.f32 %v1989_v10, %v546_v11  ;;  %v2013_v21 = vmul.f32 %v546_v11, %v546_v11  ;;  %v1776_v63 = vld [vmem:[#allocation2 + $0x798] sm:$0xff]  ;;  %1801 = vmatpush.msra.mxu0 %v1728_v2  ;;  %v2192_v10 = vld [vmem:[%s2779_s11 + $0x108] sm:$0xff]  ;;  %v1775_v11 = vld [vmem:[#allocation2 + $0x790] sm:$0xff] }
  0xfb   : > { %1353 = vmatmul.f32.vlgmr.msrb.gmra.mxu1 %v2180_v13  ;;  %1924 = vmatpush.msra.mxu3 %v1776_v63  ;;  %v2194_v13 = vld [vmem:[%s2779_s11 + $0x118] sm:$0xff]  ;;  %v2207_v63 = vld [vmem:[%s2779_s11 + $0x200] sm:$0xff] }
  0xfc   : > { %v2020_v24 = vadd.f32 %v2019_v19, %v2013_v21  ;;  %2022 = vst [vmem:[%s3016_s12 + $0x8] sm:$0xff] %v1990_v20  ;;  %1435 = vmatmul.f32.vlgmr.msrb.gmra.mxu3 %v2182_v16  ;;  %1842 = vmatpush.msra.mxu1 %v1744_v5  ;;  %v1758_v16 = vld [vmem:[#allocation2 + $0x708] sm:$0xff]  ;;  %v2197_v20 = vld [vmem:[%s2779_s11 + $0x150] sm:$0xff] }
  0xfd   : > { %v969_v25 = vpop.f32.mrf.mxu2  ;;  %1925 = vmatpush.msra.mxu3 %v1775_v11  ;;  %1802 = vmatpush.msra.mxu0 %v1727_v14  ;;  %v1726_v21 = vld [vmem:[#allocation2 + $0x608] sm:$0xff] }
  0xfe   : > { %v970_v27 = vadd.f32 %v969_v25, %v929_v15  ;;  %2024 = vst [vmem:[%s3016_s12 + $0x18] sm:$0xff] %v2020_v24  ;;  %v890_v30 = vpop.f32.mrf.mxu0  ;;  %v1743_v15 = vld [vmem:[#allocation2 + $0x690] sm:$0xff]  ;;  %1885 = vmatpush.msra.mxu2 %v1758_v16  ;;  %v2195_v24 = vld [vmem:[%s2779_s11 + $0x140] sm:$0xff]  ;;  %v1742_v25 = vld [vmem:[#allocation2 + $0x688] sm:$0xff] }
  0xff   : > { %v1010_v34 = vpop.f32.mrf.mxu3  ;;  %1843 = vmatpush.msra.mxu1 %v1743_v15  ;;  %1926 = vmatpush.msra.mxu3 %v1774_v18  ;;  %v2216_v14 = vld [vmem:[%s2779_s11 + $0x68] sm:$0x1]  ;;  %v2214_v15 = vld [vmem:[%s2779_s11 + $0x58] sm:$0xfe]  ;;  %v2218_v16 = vld [vmem:[%s2779_s11 + $0x78] sm:$0x1] }
 0x100   : > { %v3022_v35 = vadd.f32 %v1010_v34, %v970_v27  ;;  %v931_v36 = vpop.f32.mrf.mxu1  ;;  %1803 = vmatpush.msra.mxu0 %v1726_v21  ;;  %1886 = vmatpush.msra.mxu2 %v1757_v26  ;;  %v1725_v34 = vld [vmem:[#allocation2 + $0x600] sm:$0xff]  ;;  %v1600_v21 = vrot.slane %v2216_v14, 1 }
 0x101   : > { %v932_v39 = vadd.f32 %v931_v36, %v890_v30  ;;  %1315 = vmatmul.f32.gmra.mxu0 %v2183_v31  ;;  %1844 = vmatpush.msra.mxu1 %v1742_v25  ;;  %v2196_v30 = vld [vmem:[%s2779_s11 + $0x148] sm:$0xff]  ;;  %v1773_v31 = vld [vmem:[#allocation2 + $0x780] sm:$0xff]  ;;  %v1606_v25 = vrot.slane %v2218_v16, 1 }
 0x102   : > { %1397 = vmatmul.f32.gmra.mxu2 %v2185_v28  ;;  %v1741_v36 = vld [vmem:[#allocation2 + $0x680] sm:$0xff]  ;;  %1927 = vmatpush.msra.mxu3 %v1773_v31  ;;  %v2225_v31 = vld [vmem:[%s2779_s11 + $0xb0] sm:$0x1] }
 0x103   : > { %1356 = vmatmul.f32.gmra.mxu1 %v2184_v37  ;;  %1804 = vmatpush.msra.mxu0 %v1725_v34  ;;  %v2219_v34 = vld [vmem:[%s2779_s11 + $0x80] sm:$0xfe] }
 0x104   : > { %1438 = vmatmul.f32.gmra.mxu3 %v2186_v40  ;;  %1845 = vmatpush.msra.mxu1 %v1741_v36  ;;  %v2201_v40 = vld [vmem:[%s2779_s11 + $0x190] sm:$0xff]  ;;  %v2223_v36 = vld [vmem:[%s2779_s11 + $0xa0] sm:$0x1] }
 0x105   : > { %v972_v48 = vpop.f32.mrf.mxu2 }
 0x106   : > { %v973_v45 = vadd.f32 %v972_v48, %v932_v39  ;;  %v893_v49 = vpop.f32.mrf.mxu0 }
 0x107   : > { %v1013_v53 = vpop.f32.mrf.mxu3 }
 0x108   : > { %v3028_v22 = vadd.f32 %v1013_v53, %v973_v45  ;;  %v934_v54 = vpop.f32.mrf.mxu1 }
 0x109   : > { %v935_v57 = vadd.f32 %v934_v54, %v893_v49  ;;  %1318 = vmatmul.f32.gmra.mxu0 %v2187_v50 }
 0x10a   : > { %1400 = vmatmul.f32.gmra.mxu2 %v2189_v46  ;;  %v2202_v46 = vld [vmem:[%s2779_s11 + $0x198] sm:$0xff] }
 0x10b   : > { %1359 = vmatmul.f32.gmra.mxu1 %v2188_v55 }
 0x10c   : > { %1441 = vmatmul.f32.gmra.mxu3 %v2190_v58  ;;  %v2206_v58 = vld [vmem:[%s2779_s11 + $0x1d8] sm:$0xff] }
 0x10d   : > { %v975_v62 = vpop.f32.mrf.mxu2 }
 0x10e   : > { %v976_v0 = vadd.f32 %v975_v62, %v935_v57  ;;  %v896_v4 = vpop.f32.mrf.mxu0 }
 0x10f   : > { %v1016_v7 = vpop.f32.mrf.mxu3 }
 0x110   : > { %v3034_v8 = vadd.f32 %v1016_v7, %v976_v0  ;;  %v937_v9 = vpop.f32.mrf.mxu1  ;;  %v2213_v0 = vld [vmem:[%s2779_s11 + $0x50] sm:$0xfe]  ;;  %v2210_v7 = vld [vmem:[%s2779_s11 + $0x218] sm:$0xff] }
 0x111   : > { %v938_v12 = vadd.f32 %v937_v9, %v896_v4  ;;  %1321 = vmatmul.f32.gmra.mxu0 %v2191_v61  ;;  %v2211_v4 = vld [vmem:[%s2779_s11 + $0x40] sm:$0xfe]  ;;  %v2215_v61 = vld [vmem:[%s2779_s11 + $0x60] sm:$0x1]  ;;  %v2208_v9 = vld [vmem:[%s2779_s11 + $0x208] sm:$0xff]  ;;  %v1602_v11 = vrot.slane %v2213_v0, 1 }
 0x112   : > { %1403 = vmatmul.f32.gmra.mxu2 %v2193_v1  ;;  %v2217_v1 = vld [vmem:[%s2779_s11 + $0x70] sm:$0x1]  ;;  %v1597_v18 = vrot.slane %v2215_v61, 1  ;;  %v2227_v0 = vld [vmem:[%s2779_s11 + $0xc0] sm:$0xfe] }
 0x113   : > { %1362 = vmatmul.f32.gmra.mxu1 %v2192_v10  ;;  %v1620_v14 = vrot.slane %v2227_v0, 1 }
 0x114   : > { %1444 = vmatmul.f32.gmra.mxu3 %v2194_v13  ;;  %v2212_v13 = vld [vmem:[%s2779_s11 + $0x48] sm:$0xfe] }
 0x115   : > { %v978_v17 = vpop.f32.mrf.mxu2 }
 0x116   : > { %v979_v19 = vadd.f32 %v978_v17, %v938_v12  ;;  %v899_v23 = vpop.f32.mrf.mxu0  ;;  %v1603_v12 = vrot.slane %v2217_v1, 1  ;;  %v1596_v17 = vrot.slane %v2211_v4, 1  ;;  %v2231_v1 = vld [vmem:[%s2779_s11 + $0xe0] sm:$0x1] }
 0x117   : > { %v1019_v27 = vpop.f32.mrf.mxu3 }
 0x118   : > { %v3040_v28 = vadd.f32 %v1019_v27, %v979_v19  ;;  %v940_v29 = vpop.f32.mrf.mxu1  ;;  %v1604_v27 = vsel %vm676_vm0, %v1602_v11, %v1603_v12  ;;  %v2228_v11 = vld [vmem:[%s2779_s11 + $0xc8] sm:$0xfe]  ;;  %v2232_v12 = vld [vmem:[%s2779_s11 + $0xe8] sm:$0x1] }
 0x119   : > { %v941_v32 = vadd.f32 %v940_v29, %v899_v23  ;;  %1324 = vmatmul.f32.gmra.mxu0 %v2195_v24  ;;  %v1605_v24 = vrot.slane %v2214_v15, 1  ;;  %v1598_v29 = vsel %vm676_vm0, %v1596_v17, %v1597_v18  ;;  %v1621_v15 = vrot.slane %v2231_v1, 1 }
 0x11a   : > { %1406 = vmatmul.f32.gmra.mxu2 %v2197_v20  ;;  %v1599_v20 = vrot.slane %v2212_v13, 1  ;;  %v2234_v13 = vld [vmem:[%s2779_s11 + $0xf8] sm:$0x1]  ;;  %v1623_v17 = vrot.slane %v2228_v11, 1  ;;  %v1624_v18 = vrot.slane %v2232_v12, 1 }
 0x11b   : > { %1365 = vmatmul.f32.gmra.mxu1 %v2196_v30  ;;  %v2221_v30 = vld [vmem:[%s2779_s11 + $0x90] sm:$0xfe]  ;;  %v2250_v11 = vld [vmem:[%s2779_s11 + $0x178] sm:$0x1] }
 0x11c   : > { %1447 = vmatmul.f32.gmra.mxu3 %v2198_v33 }
 0x11d   : > { %v981_v37 = vpop.f32.mrf.mxu2 }
 0x11e   : > { %v982_v38 = vadd.f32 %v981_v37, %v941_v32  ;;  %v902_v39 = vpop.f32.mrf.mxu0 }
 0x11f   : > { %v1022_v43 = vpop.f32.mrf.mxu3 }
 0x120   : > { %v3046_v44 = vadd.f32 %v1022_v43, %v982_v38  ;;  %v943_v48 = vpop.f32.mrf.mxu1  ;;  %v1614_v43 = vrot.slane %v2221_v30, 1 }
 0x121   : > { %v944_v45 = vadd.f32 %v943_v48, %v902_v39  ;;  %1327 = vmatmul.f32.gmra.mxu0 %v2199_v42  ;;  %v1601_v39 = vsel %vm676_vm0, %v1599_v20, %v1600_v21  ;;  %v1607_v42 = vsel %vm676_vm0, %v1605_v24, %v1606_v25  ;;  %v1615_v48 = vrot.slane %v2225_v31, 1  ;;  %v2235_v31 = vld [vmem:[%s2779_s11 + $0x100] sm:$0xfe] }
 0x122   : > { %1409 = vmatmul.f32.gmra.mxu2 %v2201_v40  ;;  %v1630_v21 = vrot.slane %v2234_v13, 1  ;;  %v1622_v25 = vsel %vm676_vm0, %v1620_v14, %v1621_v15 }
 0x123   : > { %1368 = vmatmul.f32.gmra.mxu1 %v2200_v3  ;;  %v2220_v3 = vld [vmem:[%s2779_s11 + $0x88] sm:$0xfe] }
 0x124   : > { %1450 = vmatmul.f32.gmra.mxu3 %v2202_v46  ;;  %v2222_v46 = vld [vmem:[%s2779_s11 + $0x98] sm:$0xfe] }
 0x125   : > { %v984_v47 = vpop.f32.mrf.mxu2 }
 0x126   : > { %v985_v49 = vadd.f32 %v984_v47, %v944_v45  ;;  %v905_v50 = vpop.f32.mrf.mxu0  ;;  %v2224_v45 = vld [vmem:[%s2779_s11 + $0xa8] sm:$0x1]  ;;  %v1608_v47 = vrot.slane %v2219_v34, 1 }
 0x127   : > { %v1025_v53 = vpop.f32.mrf.mxu3 }
 0x128   : > { %v3052_v54 = vadd.f32 %v1025_v53, %v985_v49  ;;  %v946_v55 = vpop.f32.mrf.mxu1  ;;  %v1609_v49 = vrot.slane %v2223_v36, 1  ;;  %v1625_v36 = vsel %vm676_vm0, %v1623_v17, %v1624_v18  ;;  %v1654_v18 = vrot.slane %v2250_v11, 1 }
 0x129   : > { %v947_v57 = vadd.f32 %v946_v55, %v905_v50  ;;  %1330 = vmatmul.f32.gmra.mxu0 %v2203_v52  ;;  %v1612_v52 = vrot.slane %v2224_v45, 1  ;;  %v1617_v55 = vrot.slane %v2222_v46, 1  ;;  %v1632_v45 = vrot.slane %v2235_v31, 1 }
 0x12a   : > { %1412 = vmatmul.f32.gmra.mxu2 %v2205_v51  ;;  %v1611_v51 = vrot.slane %v2220_v3, 1  ;;  %v2242_v3 = vld [vmem:[%s2779_s11 + $0x138] sm:$0x1] }
 0x12b   : > { %1371 = vmatmul.f32.gmra.mxu1 %v2204_v56 }
 0x12c   : > { %1453 = vmatmul.f32.gmra.mxu3 %v2206_v58  ;;  %v1616_v58 = vsel %vm676_vm0, %v1614_v43, %v1615_v48  ;;  %v1613_v61 = vsel %vm676_vm0, %v1611_v51, %v1612_v52  ;;  %v2236_v43 = vld [vmem:[%s2779_s11 + $0x108] sm:$0xfe]  ;;  %v2240_v48 = vld [vmem:[%s2779_s11 + $0x128] sm:$0x1]  ;;  %v1642_v52 = vrot.slane %v2242_v3, 1 }
 0x12d   : > { %v987_v41 = vpop.f32.mrf.mxu2 }
 0x12e   : > { %v988_v59 = vadd.f32 %v987_v41, %v947_v57  ;;  %v908_v62 = vpop.f32.mrf.mxu0  ;;  %v1610_v41 = vsel %vm676_vm0, %v1608_v47, %v1609_v49  ;;  %v1635_v47 = vrot.slane %v2236_v43, 1  ;;  %v1636_v49 = vrot.slane %v2240_v48, 1  ;;  %v2258_v43 = vld [vmem:[%s2779_s11 + $0x1b8] sm:$0x1] }
 0x12f   : > { %v1028_v2 = vpop.f32.mrf.mxu3 }
 0x130   : > { %v3062_v5 = vadd.f32 %v1028_v2, %v988_v59  ;;  %v949_v6 = vpop.f32.mrf.mxu1  ;;  %v2229_v59 = vld [vmem:[%s2779_s11 + $0xd0] sm:$0xfe]  ;;  %v1637_v1 = vsel %vm676_vm0, %v1635_v47, %v1636_v49  ;;  %v1666_v49 = vrot.slane %v2258_v43, 1 }
 0x131   : > { %v950_v10 = vadd.f32 %v949_v6, %v908_v62  ;;  %1333 = vmatmul.f32.gmra.mxu0 %v2207_v63 }
 0x132   : > { %1415 = vmatmul.f32.gmra.mxu2 %v2209_v60  ;;  %v2233_v60 = vld [vmem:[%s2779_s11 + $0xf0] sm:$0x1] }
 0x133   : > { %1374 = vmatmul.f32.gmra.mxu1 %v2208_v9  ;;  %v1626_v9 = vrot.slane %v2229_v59, 1 }
 0x134   : > { %1456 = vmatmul.f32.gmra.mxu3 %v2210_v7 }
 0x135   : > { %v990_v19 = vpop.f32.mrf.mxu2 }
 0x136   : > { %v991_v23 = vadd.f32 %v990_v19, %v950_v10  ;;  %v1051_v26 = vpop.f32.mrf.mxu0  ;;  %v1627_v10 = vrot.slane %v2233_v60, 1  ;;  %v2243_v60 = vld [vmem:[%s2779_s11 + $0x140] sm:$0xfe] }
 0x137   : > { %v1031_v32 = vpop.f32.mrf.mxu3  ;;  %v1052_v33 = vadd.f32 %v1051_v26, %v3022_v35  ;;  %v2226_v35 = vld [vmem:[%s2779_s11 + $0xb8] sm:$0x1]  ;;  %v2237_v26 = vld [vmem:[%s2779_s11 + $0x110] sm:$0xfe]  ;;  %v1644_v12 = vrot.slane %v2243_v60, 1 }
 0x138   : > { %v3077_v37 = vadd.f32 %v1031_v32, %v991_v23  ;;  %v1092_v38 = vpop.f32.mrf.mxu1  ;;  %v1618_v56 = vrot.slane %v2226_v35, 1  ;;  %v1628_v24 = vsel %vm676_vm0, %v1626_v9, %v1627_v10  ;;  %v2239_v32 = vld [vmem:[%s2779_s11 + $0x120] sm:$0x1]  ;;  %v2244_v9 = vld [vmem:[%s2779_s11 + $0x148] sm:$0xfe] }
 0x139   : > { %v1093_v40 = vadd.f32 %v1092_v38, %v1052_v33  ;;  %1805 = vmatmul.f32.vlgmr.msra.gmra.mxu0 %v1598_v29  ;;  %v1633_v46 = vrot.slane %v2239_v32, 1  ;;  %v2248_v10 = vld [vmem:[%s2779_s11 + $0x168] sm:$0x1]  ;;  %v1647_v14 = vrot.slane %v2244_v9, 1  ;;  %v2266_v9 = vld [vmem:[%s2779_s11 + $0x1f8] sm:$0x1] }
 0x13a   : > { %1887 = vmatmul.f32.vlgmr.msra.gmra.mxu2 %v1604_v27  ;;  %v1619_v7 = vsel %vm676_vm0, %v1617_v55, %v1618_v56  ;;  %v2241_v27 = vld [vmem:[%s2779_s11 + $0x130] sm:$0x1]  ;;  %v1648_v15 = vrot.slane %v2248_v10, 1 }
 0x13b   : > { %1846 = vmatmul.f32.vlgmr.msra.gmra.mxu1 %v1601_v39  ;;  %v1634_v56 = vsel %vm676_vm0, %v1632_v45, %v1633_v46 }
 0x13c   : > { %1928 = vmatmul.f32.vlgmr.msra.gmra.mxu3 %v1607_v42  ;;  %v1639_v42 = vrot.slane %v2241_v27, 1  ;;  %v2251_v27 = vld [vmem:[%s2779_s11 + $0x180] sm:$0xfe]  ;;  %v1649_v32 = vsel %vm676_vm0, %v1647_v14, %v1648_v15  ;;  %v1678_v15 = vrot.slane %v2266_v9, 1 }
 0x13d   : > { %v1133_v50 = vpop.f32.mrf.mxu2  ;;  %v1656_v48 = vrot.slane %v2251_v27, 1 }
 0x13e   : > { %v1134_v53 = vadd.f32 %v1133_v50, %v1093_v40  ;;  %v1054_v57 = vpop.f32.mrf.mxu0  ;;  %v1638_v40 = vrot.slane %v2237_v26, 1 }
 0x13f   : > { %v1055_v62 = vadd.f32 %v1054_v57, %v3028_v22  ;;  %v1174_v63 = vpop.f32.mrf.mxu3  ;;  %v2230_v22 = vld [vmem:[%s2779_s11 + $0xd8] sm:$0xfe]  ;;  %v2245_v57 = vld [vmem:[%s2779_s11 + $0x150] sm:$0xfe] }
 0x140   : > { %v3092_v2 = vadd.f32 %v1174_v63, %v1134_v53  ;;  %v1095_v4 = vpop.f32.mrf.mxu1  ;;  %v1629_v20 = vrot.slane %v2230_v22, 1  ;;  %v1640_v55 = vsel %vm676_vm0, %v1638_v40, %v1639_v42  ;;  %v2252_v40 = vld [vmem:[%s2779_s11 + $0x188] sm:$0xfe]  ;;  %v2256_v42 = vld [vmem:[%s2779_s11 + $0x1a8] sm:$0x1] }
 0x141   : > { %v1096_v6 = vadd.f32 %v1095_v4, %v1055_v62  ;;  %1808 = vmatmul.f32.gmra.mxu0 %v1610_v41  ;;  %v2247_v62 = vld [vmem:[%s2779_s11 + $0x160] sm:$0x1]  ;;  %v1659_v45 = vrot.slane %v2252_v40, 1  ;;  %v1660_v46 = vrot.slane %v2256_v42, 1  ;;  %v2270_v40 = vld [vmem:[%s2779_s11 + $0x218] sm:$0xfe] }
 0x142   : > { %1890 = vmatmul.f32.gmra.mxu2 %v1616_v58  ;;  %v1631_v39 = vsel %vm676_vm0, %v1629_v20, %v1630_v21  ;;  %v2249_v58 = vld [vmem:[%s2779_s11 + $0x170] sm:$0x1]  ;;  %v1645_v22 = vrot.slane %v2247_v62, 1 }
 0x143   : > { %1849 = vmatmul.f32.gmra.mxu1 %v1613_v61  ;;  %v1661_v62 = vsel %vm676_vm0, %v1659_v45, %v1660_v46  ;;  %v1689_v45 = vrot.slane %v2270_v40, 1 }
 0x144   : > { %1931 = vmatmul.f32.gmra.mxu3 %v1619_v7  ;;  %v1651_v7 = vrot.slane %v2249_v58, 1  ;;  %v1646_v21 = vsel %vm676_vm0, %v1644_v12, %v1645_v22  ;;  %v2259_v58 = vld [vmem:[%s2779_s11 + $0x1c0] sm:$0xfe] }
 0x145   : > { %v1136_v16 = vpop.f32.mrf.mxu2  ;;  %v1668_v10 = vrot.slane %v2259_v58, 1 }
 0x146   : > { %v1137_v19 = vadd.f32 %v1136_v16, %v1096_v6  ;;  %v1057_v23 = vpop.f32.mrf.mxu0  ;;  %v1650_v6 = vrot.slane %v2245_v57, 1 }
 0x147   : > { %v1058_v29 = vadd.f32 %v1057_v23, %v3034_v8  ;;  %v1177_v30 = vpop.f32.mrf.mxu3  ;;  %v2238_v8 = vld [vmem:[%s2779_s11 + $0x118] sm:$0xfe]  ;;  %v2253_v23 = vld [vmem:[%s2779_s11 + $0x190] sm:$0xfe] }
 0x148   : > { %v3107_v33 = vadd.f32 %v1177_v30, %v1137_v19  ;;  %v1098_v34 = vpop.f32.mrf.mxu1  ;;  %v1641_v51 = vrot.slane %v2238_v8, 1  ;;  %v1652_v20 = vsel %vm676_vm0, %v1650_v6, %v1651_v7  ;;  %v2260_v6 = vld [vmem:[%s2779_s11 + $0x1c8] sm:$0xfe]  ;;  %v2264_v7 = vld [vmem:[%s2779_s11 + $0x1e8] sm:$0x1] }
 0x149   : > { %v1099_v38 = vadd.f32 %v1098_v34, %v1058_v29  ;;  %1811 = vmatmul.f32.gmra.mxu0 %v1622_v25  ;;  %v2255_v29 = vld [vmem:[%s2779_s11 + $0x1a0] sm:$0x1]  ;;  %v1671_v12 = vrot.slane %v2260_v6, 1  ;;  %v1672_v22 = vrot.slane %v2264_v7, 1 }
 0x14a   : > { %1893 = vmatmul.f32.gmra.mxu2 %v1628_v24  ;;  %v1643_v61 = vsel %vm676_vm0, %v1641_v51, %v1642_v52  ;;  %v2257_v24 = vld [vmem:[%s2779_s11 + $0x1b0] sm:$0x1]  ;;  %v1657_v8 = vrot.slane %v2255_v29, 1 }
 0x14b   : > { %1852 = vmatmul.f32.gmra.mxu1 %v1625_v36  ;;  %v1673_v29 = vsel %vm676_vm0, %v1671_v12, %v1672_v22 }
 0x14c   : > { %1934 = vmatmul.f32.gmra.mxu3 %v1631_v39  ;;  %v1663_v39 = vrot.slane %v2257_v24, 1  ;;  %v1658_v52 = vsel %vm676_vm0, %v1656_v48, %v1657_v8  ;;  %v2267_v24 = vld [vmem:[%s2779_s11 + $0x200] sm:$0xfe] }
 0x14d   : > { %v1139_v35 = vpop.f32.mrf.mxu2  ;;  %v1680_v42 = vrot.slane %v2267_v24, 1 }
 0x14e   : > { %v1140_v50 = vadd.f32 %v1139_v35, %v1099_v38  ;;  %v1060_v53 = vpop.f32.mrf.mxu0  ;;  %v1662_v38 = vrot.slane %v2253_v23, 1 }
 0x14f   : > { %v1061_v41 = vadd.f32 %v1060_v53, %v3040_v28  ;;  %v1180_v59 = vpop.f32.mrf.mxu3  ;;  %v2246_v28 = vld [vmem:[%s2779_s11 + $0x158] sm:$0xfe]  ;;  %v2261_v53 = vld [vmem:[%s2779_s11 + $0x1d0] sm:$0xfe] }
 0x150   : > { %v3122_v63 = vadd.f32 %v1180_v59, %v1140_v50  ;;  %v1101_v0 = vpop.f32.mrf.mxu1  ;;  %v1653_v17 = vrot.slane %v2246_v28, 1  ;;  %v1664_v51 = vsel %vm676_vm0, %v1662_v38, %v1663_v39  ;;  %v2268_v38 = vld [vmem:[%s2779_s11 + $0x208] sm:$0xfe]  ;;  %v2272_v39 = vld [vmem:[%s2779_s11 + $0x228] sm:$0x1] }
 0x151   : > { %v1102_v4 = vadd.f32 %v1101_v0, %v1061_v41  ;;  %1814 = vmatmul.f32.gmra.mxu0 %v1634_v56  ;;  %v2263_v41 = vld [vmem:[%s2779_s11 + $0x1e0] sm:$0x1]  ;;  %v1683_v48 = vrot.slane %v2268_v38, 1  ;;  %v1684_v8 = vrot.slane %v2272_v39, 1 }
 0x152   : > { %1896 = vmatmul.f32.gmra.mxu2 %v1640_v55  ;;  %v1655_v36 = vsel %vm676_vm0, %v1653_v17, %v1654_v18  ;;  %v2265_v55 = vld [vmem:[%s2779_s11 + $0x1f0] sm:$0x1]  ;;  %v1669_v28 = vrot.slane %v2263_v41, 1 }
 0x153   : > { %1855 = vmatmul.f32.gmra.mxu1 %v1637_v1 }
 0x154   : > { %1937 = vmatmul.f32.gmra.mxu3 %v1643_v61  ;;  %v1675_v61 = vrot.slane %v2265_v55, 1  ;;  %v1670_v18 = vsel %vm676_vm0, %v1668_v10, %v1669_v28  ;;  %v1685_v55 = vsel %vm676_vm0, %v1683_v48, %v1684_v8 }
 0x155   : > { %v1142_v13 = vpop.f32.mrf.mxu2 }
 0x156   : > { %v1143_v16 = vadd.f32 %v1142_v13, %v1102_v4  ;;  %v1063_v19 = vpop.f32.mrf.mxu0  ;;  %v1674_v4 = vrot.slane %v2261_v53, 1 }
 0x157   : > { %v1064_v25 = vadd.f32 %v1063_v19, %v3046_v44  ;;  %v1183_v26 = vpop.f32.mrf.mxu3  ;;  %v2254_v44 = vld [vmem:[%s2779_s11 + $0x198] sm:$0xfe]  ;;  %v2269_v19 = vld [vmem:[%s2779_s11 + $0x210] sm:$0xfe] }
 0x158   : > { %v3137_v30 = vadd.f32 %v1183_v26, %v1143_v16  ;;  %v1104_v31 = vpop.f32.mrf.mxu1  ;;  %v1665_v47 = vrot.slane %v2254_v44, 1  ;;  %v1676_v17 = vsel %vm676_vm0, %v1674_v4, %v1675_v61 }
 0x159   : > { %v1105_v34 = vadd.f32 %v1104_v31, %v1064_v25  ;;  %1817 = vmatmul.f32.gmra.mxu0 %v1646_v21  ;;  %v2271_v25 = vld [vmem:[%s2779_s11 + $0x220] sm:$0x1] }
 0x15a   : > { %1899 = vmatmul.f32.gmra.mxu2 %v1652_v20  ;;  %v1667_v1 = vsel %vm676_vm0, %v1665_v47, %v1666_v49  ;;  %v2273_v20 = vld [vmem:[%s2779_s11 + $0x230] sm:$0x1]  ;;  %v1681_v44 = vrot.slane %v2271_v25, 1 }
 0x15b   : > { %1858 = vmatmul.f32.gmra.mxu1 %v1649_v32 }
 0x15c   : > { %1940 = vmatmul.f32.gmra.mxu3 %v1655_v36  ;;  %v1687_v36 = vrot.slane %v2273_v20, 1  ;;  %v1682_v49 = vsel %vm676_vm0, %v1680_v42, %v1681_v44 }
 0x15d   : > { %v1145_v3 = vpop.f32.mrf.mxu2 }
 0x15e   : > { %v1146_v35 = vadd.f32 %v1145_v3, %v1105_v34  ;;  %v1066_v50 = vpop.f32.mrf.mxu0  ;;  %v1686_v34 = vrot.slane %v2269_v19, 1 }
 0x15f   : > { %v1067_v56 = vadd.f32 %v1066_v50, %v3052_v54  ;;  %v1186_v57 = vpop.f32.mrf.mxu3  ;;  %v2262_v54 = vld [vmem:[%s2779_s11 + $0x1d8] sm:$0xfe] }
 0x160   : > { %v3152_v59 = vadd.f32 %v1186_v57, %v1146_v35  ;;  %v1107_v60 = vpop.f32.mrf.mxu1  ;;  %v1677_v14 = vrot.slane %v2262_v54, 1  ;;  %v1688_v47 = vsel %vm676_vm0, %v1686_v34, %v1687_v36 }
 0x161   : > { %v1108_v0 = vadd.f32 %v1107_v60, %v1067_v56  ;;  %1820 = vmatmul.f32.gmra.mxu0 %v1658_v52 }
 0x162   : > { %1902 = vmatmul.f32.gmra.mxu2 %v1664_v51  ;;  %v1679_v32 = vsel %vm676_vm0, %v1677_v14, %v1678_v15 }
 0x163   : > { %1861 = vmatmul.f32.gmra.mxu1 %v1661_v62 }
 0x164   : > { %1943 = vmatmul.f32.gmra.mxu3 %v1667_v1 }
 0x165   : > { %v1148_v11 = vpop.f32.mrf.mxu2 }
 0x166   : > { %v1149_v13 = vadd.f32 %v1148_v11, %v1108_v0  ;;  %v1069_v16 = vpop.f32.mrf.mxu0 }
 0x167   : > { %v1070_v21 = vadd.f32 %v1069_v16, %v3062_v5  ;;  %v1189_v23 = vpop.f32.mrf.mxu3  ;;  %v2274_v5 = vld [vmem:[%s2779_s11 + $0x238] sm:$0x1]  ;;  %s2283_s11 = sshll.u32 %s2558_s19, 7  ;;  %s2062_s19 = sshll.u32 %s3260_s29, 4  ;;  %s2063_s19 = int_to_ptr.hbm [resolvable:$true] %s2062_s19 }
 0x168   : > { %v3167_v26 = vadd.f32 %v1189_v23, %v1149_v13  ;;  %v1110_v27 = vpop.f32.mrf.mxu1  ;;  %v1690_v46 = vrot.slane %v2274_v5, 1  ;;  %s2042_s20 = scalar_lea.hbm %s3311_s3, %s2283_s11 }
 0x169   : > { %v1111_v31 = vadd.f32 %v1110_v27, %v1070_v21  ;;  %1823 = vmatmul.f32.gmra.mxu0 %v1670_v18  ;;  %s2045_s8 = sshll.u32 %s2042_s20, 4  ;;  %s2046_s8 = int_to_ptr.hbm [resolvable:$true] %s2045_s8 }
 0x16a   : > { %1905 = vmatmul.f32.gmra.mxu2 %v1676_v17  ;;  %v1691_v57 = vsel %vm676_vm0, %v1689_v45, %v1690_v46  ;;  %s2421_s6 = sshra.s32 %s2046_s8, 4  ;;  %s2422_s6 = int_to_ptr.hbm [resolvable:$true] %s2421_s6 }
 0x16b   : > { %1864 = vmatmul.f32.gmra.mxu1 %v1673_v29  ;;  %s2423_s10 = scalar_lea.hbm %s2422_s6, 128  ;;  %p2428_p3 = scmp.lt.s32.totalorder %s2422_s6, %s3311_s3 }
 0x16c   : > { %1946 = vmatmul.f32.gmra.mxu3 %v1679_v32  ;;  %p2424_p0 = scmp.ne.s32.totalorder %s2422_s6, %s2423_s10  ;;  %p2429_p4 = scmp.lt.s32.totalorder %s2427_s14, %s2423_s10 }
 0x16d   : > { %v1151_v43 = vpop.f32.mrf.mxu2 }
 0x16e   : > { %v1152_v3 = vadd.f32 %v1151_v43, %v1111_v31  ;;  %v1072_v35 = vpop.f32.mrf.mxu0  ;;  %p2425_p1 = pnand %p2424_p0, %p2575_p5  ;;  %p2430_p7 = por %p2429_p4, %p2428_p3 }
 0x16f   : > { %v1073_v50 = vadd.f32 %v1072_v35, %v3077_v37  ;;  %v1192_v51 = vpop.f32.mrf.mxu3 }
 0x170   : > { %v3178_v52 = vadd.f32 %v1192_v51, %v1152_v3  ;;  %v1113_v53 = vpop.f32.mrf.mxu1  ;;  %p2426_p2 = pneg %p2425_p1 }
 0x171   : > { %v1114_v56 = vadd.f32 %v1113_v53, %v1073_v50  ;;  %1826 = vmatmul.f32.gmra.mxu0 %v1682_v49 }
 0x172   : > { %1908 = vmatmul.f32.gmra.mxu2 %v1688_v47  ;;  %p2431_p8 = pnand %p2430_p7, %p2426_p2 }
 0x173   : > { %1867 = vmatmul.f32.gmra.mxu1 %v1685_v55 }
 0x174   : > { %1949 = vmatmul.f32.gmra.mxu3 %v1691_v57 }
 0x175   : > { %v1154_v58 = vpop.f32.mrf.mxu2 }
 0x176   : > { %v1155_v41 = vadd.f32 %v1154_v58, %v1114_v56  ;;  %v1313_v60 = vpop.f32.mrf.mxu0 }
 0x177   : > { %v1195_v62 = vpop.f32.mrf.mxu3 }
 0x178   : > { %v3182_v0 = vadd.f32 %v1195_v62, %v1155_v41  ;;  %v1354_v37 = vpop.f32.mrf.mxu1 }
 0x179   : > { %v1355_v34 = vadd.f32 %v1354_v37, %v1313_v60 }
 0x17d   : > { %v1395_v1 = vpop.f32.mrf.mxu2 }
 0x17e   : > { %v1316_v4 = vpop.f32.mrf.mxu0  ;;  %v1396_v40 = vadd.f32 %v1395_v1, %v1355_v34 }
 0x17f   : > { %v1436_v61 = vpop.f32.mrf.mxu3 }
 0x180   : > { %v1357_v6 = vpop.f32.mrf.mxu1  ;;  %v1437_v44 = vadd.f32 %v1436_v61, %v1396_v40 }
 0x181   : > { %v1358_v43 = vadd.f32 %v1357_v6, %v1316_v4 }
 0x182   : > { %v1460_v46 = vadd.f32 %v1437_v44, %v3092_v2 }
 0x185   : > { %v1398_v7 = vpop.f32.mrf.mxu2 }
 0x186   : > { %v1319_v54 = vpop.f32.mrf.mxu0  ;;  %v1399_v35 = vadd.f32 %v1398_v7, %v1358_v43 }
 0x187   : > { %v1439_v9 = vpop.f32.mrf.mxu3 }
 0x188   : > { %v1360_v10 = vpop.f32.mrf.mxu1  ;;  %v1440_v55 = vadd.f32 %v1439_v9, %v1399_v35 }
 0x189   : > { %v1361_v53 = vadd.f32 %v1360_v10, %v1319_v54 }
 0x18a   : > { %v1461_v62 = vadd.f32 %v1440_v55, %v3107_v33 }
 0x18d   : > { %v1401_v28 = vpop.f32.mrf.mxu2 }
 0x18e   : > { %v1322_v11 = vpop.f32.mrf.mxu0  ;;  %v1402_v41 = vadd.f32 %v1401_v28, %v1361_v53 }
 0x18f   : > { %v1442_v12 = vpop.f32.mrf.mxu3 }
 0x190   : > { %v1363_v22 = vpop.f32.mrf.mxu1  ;;  %v1443_v61 = vadd.f32 %v1442_v12, %v1402_v41 }
 0x191   : > { %v1364_v6 = vadd.f32 %v1363_v22, %v1322_v11 }
 0x192   : > { %v1462_v28 = vadd.f32 %v1443_v61, %v3122_v63 }
 0x195   : > { %v1404_v13 = vpop.f32.mrf.mxu2 }
 0x196   : > { %v3184_v14 = vpop.f32.mrf.mxu0 }
 0x197   : > { %v3186_v15 = vpop.f32.mrf.mxu3 }
 0x198   : > { %v3188_v16 = vpop.f32.mrf.mxu1 }
 0x199   : > { %v1367_v11 = vadd.f32 %v3188_v16, %v3184_v14 }
 0x19d   : > { %v3190_v17 = vpop.f32.mrf.mxu2 }
 0x19e   : > { %v3192_v18 = vpop.f32.mrf.mxu0 }
 0x19f   : > { %v3194_v19 = vpop.f32.mrf.mxu3 }
 0x1a0   : > { %v3196_v20 = vpop.f32.mrf.mxu1 }
 0x1a1   : > { %v1370_v14 = vadd.f32 %v3196_v20, %v3192_v18 }
 0x1a5   : > { %v3198_v21 = vpop.f32.mrf.mxu2 }
 0x1a6   : > { %v3200_v23 = vpop.f32.mrf.mxu0 }
 0x1a7   : > { %v3202_v24 = vpop.f32.mrf.mxu3 }
 0x1a8   : > { %v3204_v25 = vpop.f32.mrf.mxu1 }
 0x1a9   : > { %v1373_v18 = vadd.f32 %v3204_v25, %v3200_v23 }
 0x1ad   : > { %v3206_v27 = vpop.f32.mrf.mxu2 }
 0x1ae   : > { %v3208_v29 = vpop.f32.mrf.mxu0 }
 0x1af   : > { %v3210_v31 = vpop.f32.mrf.mxu3 }
 0x1b0   : > { %v3212_v32 = vpop.f32.mrf.mxu1 }
 0x1b1   : > { %v1376_v25 = vadd.f32 %v3212_v32, %v3208_v29 }
 0x1b5   : > { %v3214_v36 = vpop.f32.mrf.mxu2 }
 0x1b6   : > { %v1806_v38 = vpop.f32.mrf.mxu0 }
 0x1b7   : > { %v3216_v39 = vpop.f32.mrf.mxu3 }
 0x1b8   : > { %v1847_v5 = vpop.f32.mrf.mxu1 }
 0x1b9   : > { %v1848_v42 = vadd.f32 %v1847_v5, %v1806_v38 }
 0x1bd   : > { %v1888_v48 = vpop.f32.mrf.mxu2 }
 0x1be   : > { %v1889_v8 = vadd.f32 %v1888_v48, %v1848_v42  ;;  %v1809_v3 = vpop.f32.mrf.mxu0  ;;  %v1405_v42 = vadd.f32 %v1404_v13, %v1364_v6  ;;  %v1408_v13 = vadd.f32 %v3190_v17, %v1367_v11 }
 0x1bf   : > { %v1929_v45 = vpop.f32.mrf.mxu3 }
 0x1c0   : > { %v1930_v47 = vadd.f32 %v1929_v45, %v1889_v8  ;;  %v1850_v49 = vpop.f32.mrf.mxu1  ;;  %v1446_v12 = vadd.f32 %v3186_v15, %v1405_v42  ;;  %v1449_v53 = vadd.f32 %v3194_v19, %v1408_v13 }
 0x1c1   : > { %v1851_v50 = vadd.f32 %v1850_v49, %v1809_v3 }
 0x1c2   : > { %v1953_v51 = vadd.f32 %v1930_v47, %v1460_v46  ;;  %v1463_v63 = vadd.f32 %v1446_v12, %v3137_v30  ;;  %v1464_v17 = vadd.f32 %v1449_v53, %v3152_v59 }
 0x1c4   : > { %1961 = vst [vmem:[%s2939_s9] sm:$0xff] %v1953_v51  ;;  %v1991_v7 = vmul.f32 %v1953_v51, %v1953_v51 }
 0x1c5   : > { %v1891_v56 = vpop.f32.mrf.mxu2 }
 0x1c6   : > { %v1892_v57 = vadd.f32 %v1891_v56, %v1851_v50  ;;  %v1812_v58 = vpop.f32.mrf.mxu0 }
 0x1c7   : > { %v1932_v60 = vpop.f32.mrf.mxu3 }
 0x1c8   : > { %v1933_v37 = vadd.f32 %v1932_v60, %v1892_v57  ;;  %v1853_v1 = vpop.f32.mrf.mxu1  ;;  %v1411_v60 = vadd.f32 %v3198_v21, %v1370_v14 }
 0x1c9   : > { %v1854_v4 = vadd.f32 %v1853_v1, %v1812_v58 }
 0x1ca   : > { %v1954_v2 = vadd.f32 %v1933_v37, %v1461_v62 }
 0x1cc   : > { %1963 = vst [vmem:[%s2939_s9 + $0x10] sm:$0xff] %v1954_v2  ;;  %v1977_v54 = vadd.f32 %v1954_v2, %v1953_v51  ;;  %v1992_v10 = vmul.f32 %v1954_v2, %v1954_v2 }
 0x1cd   : > { %v1894_v9 = vpop.f32.mrf.mxu2 }
 0x1ce   : > { %v1895_v34 = vadd.f32 %v1894_v9, %v1854_v4  ;;  %v1999_v38 = vadd.f32 %v1992_v10, %v1991_v7  ;;  %v1815_v40 = vpop.f32.mrf.mxu0  ;;  %v1452_v4 = vadd.f32 %v3202_v24, %v1411_v60  ;;  %v1414_v10 = vadd.f32 %v3206_v27, %v1373_v18 }
 0x1cf   : > { %v1935_v5 = vpop.f32.mrf.mxu3 }
 0x1d0   : > { %v1936_v33 = vadd.f32 %v1935_v5, %v1895_v34  ;;  %v1856_v44 = vpop.f32.mrf.mxu1  ;;  %v1465_v21 = vadd.f32 %v1452_v4, %v3167_v26  ;;  %v1455_v23 = vadd.f32 %v3210_v31, %v1414_v10 }
 0x1d1   : > { %v1857_v43 = vadd.f32 %v1856_v44, %v1815_v40 }
 0x1d2   : > { %v1955_v48 = vadd.f32 %v1936_v33, %v1462_v28  ;;  %v1466_v44 = vadd.f32 %v1455_v23, %v3178_v52 }
 0x1d4   : > { %1965 = vst [vmem:[%s2939_s9 + $0x20] sm:$0xff] %v1955_v48  ;;  %v1978_v22 = vadd.f32 %v1977_v54, %v1955_v48  ;;  %v1993_v8 = vmul.f32 %v1955_v48, %v1955_v48 }
 0x1d5   : > { %v1897_v3 = vpop.f32.mrf.mxu2 }
 0x1d6   : > { %v1898_v45 = vadd.f32 %v1897_v3, %v1857_v43  ;;  %v2000_v46 = vadd.f32 %v1999_v38, %v1993_v8  ;;  %v1818_v35 = vpop.f32.mrf.mxu0  ;;  %v1417_v43 = vadd.f32 %v3214_v36, %v1376_v25 }
 0x1d7   : > { %v1938_v47 = vpop.f32.mrf.mxu3 }
 0x1d8   : > { %v1939_v49 = vadd.f32 %v1938_v47, %v1898_v45  ;;  %v1859_v50 = vpop.f32.mrf.mxu1  ;;  %v1458_v12 = vadd.f32 %v3216_v39, %v1417_v43 }
 0x1d9   : > { %v1860_v51 = vadd.f32 %v1859_v50, %v1818_v35 }
 0x1da   : > { %v1956_v15 = vadd.f32 %v1939_v49, %v1463_v63  ;;  %v1467_v45 = vadd.f32 %v1458_v12, %v3182_v0 }
 0x1dc   : > { %1967 = vst [vmem:[%s2939_s9 + $0x30] sm:$0xff] %v1956_v15  ;;  %v1979_v16 = vadd.f32 %v1978_v22, %v1956_v15  ;;  %v1994_v55 = vmul.f32 %v1956_v15, %v1956_v15 }
 0x1dd   : > { %v1900_v56 = vpop.f32.mrf.mxu2 }
 0x1de   : > { %v1901_v57 = vadd.f32 %v1900_v56, %v1860_v51  ;;  %v2001_v58 = vadd.f32 %v2000_v46, %v1994_v55  ;;  %v1821_v41 = vpop.f32.mrf.mxu0 }
 0x1df   : > { %v1941_v30 = vpop.f32.mrf.mxu3 }
 0x1e0   : > { %v1942_v62 = vadd.f32 %v1941_v30, %v1901_v57  ;;  %v1862_v37 = vpop.f32.mrf.mxu1 }
 0x1e1   : > { %v1863_v1 = vadd.f32 %v1862_v37, %v1821_v41 }
 0x1e2   : > { %v1957_v19 = vadd.f32 %v1942_v62, %v1464_v17 }
 0x1e4   : > { %1969 = vst [vmem:[%s2939_s9 + $0x40] sm:$0xff] %v1957_v19  ;;  %v1980_v20 = vadd.f32 %v1979_v16, %v1957_v19  ;;  %v1995_v2 = vmul.f32 %v1957_v19, %v1957_v19 }
 0x1e5   : > { %v1903_v61 = vpop.f32.mrf.mxu2 }
 0x1e6   : > { %v1904_v6 = vadd.f32 %v1903_v61, %v1863_v1  ;;  %v2002_v7 = vadd.f32 %v2001_v58, %v1995_v2  ;;  %v1824_v54 = vpop.f32.mrf.mxu0 }
 0x1e7   : > { %v1944_v59 = vpop.f32.mrf.mxu3 }
 0x1e8   : > { %v1945_v9 = vadd.f32 %v1944_v59, %v1904_v6  ;;  %v1865_v34 = vpop.f32.mrf.mxu1 }
 0x1e9   : > { %v1866_v38 = vadd.f32 %v1865_v34, %v1824_v54 }
 0x1ea   : > { %v1958_v24 = vadd.f32 %v1945_v9, %v1465_v21 }
 0x1ec   : > { %1971 = vst [vmem:[%s2939_s9 + $0x50] sm:$0xff] %v1958_v24  ;;  %v1981_v40 = vadd.f32 %v1980_v20, %v1958_v24  ;;  %v1996_v5 = vmul.f32 %v1958_v24, %v1958_v24 }
 0x1ed   : > { %v1906_v28 = vpop.f32.mrf.mxu2 }
 0x1ee   : > { %v1907_v42 = vadd.f32 %v1906_v28, %v1866_v38  ;;  %v2003_v33 = vadd.f32 %v2002_v7, %v1996_v5  ;;  %v1827_v26 = vpop.f32.mrf.mxu0 }
 0x1ef   : > { %v1947_v27 = vpop.f32.mrf.mxu3 }
 0x1f0   : > { %v1948_v48 = vadd.f32 %v1947_v27, %v1907_v42  ;;  %v1868_v31 = vpop.f32.mrf.mxu1 }
 0x1f1   : > { %v1869_v29 = vadd.f32 %v1868_v31, %v1827_v26 }
 0x1f2   : > { %v1959_v32 = vadd.f32 %v1948_v48, %v1466_v44 }
 0x1f4   : > { %1973 = vst [vmem:[%s2939_s9 + $0x60] sm:$0xff] %v1959_v32  ;;  %v1982_v11 = vadd.f32 %v1981_v40, %v1959_v32  ;;  %v1997_v22 = vmul.f32 %v1959_v32, %v1959_v32 }
 0x1f5   : > { %v1909_v8 = vpop.f32.mrf.mxu2 }
 0x1f6   : > { %v1910_v52 = vadd.f32 %v1909_v8, %v1869_v29  ;;  %v2004_v36 = vadd.f32 %v2003_v33, %v1997_v22 }
 0x1f7   : > { %v1950_v3 = vpop.f32.mrf.mxu3 }
 0x1f8   : > { %v1951_v46 = vadd.f32 %v1950_v3, %v1910_v52 }
 0x1fa   : > { %v1960_v39 = vadd.f32 %v1951_v46, %v1467_v45 }
 0x1fc   : > { %1975 = vst [vmem:[%s2939_s9 + $0x70] sm:$0xff] %v1960_v39  ;;  %v1983_v35 = vadd.f32 %v1982_v11, %v1960_v39  ;;  %v1998_v47 = vmul.f32 %v1960_v39, %v1960_v39 }
 0x1fd   : > { %2434 = shalt.err (!%p2431_p8)
}
 0x1fe   : > { %s2510_s9 = smov 256   ;;  %s2511_s27 = smov 16   ;;  %v2005_v0 = vadd.f32 %v2004_v36, %v1998_v47  ;;  %2021 = vst [vmem:[%s3016_s12] sm:$0xff] %v1983_v35 }
 0x1ff   : > { %2290 = dma.vmem_to_hbm [thread:$0]  (%p2575_p5), %s2044_s7, 2048, %s2046_s8, %s2026_s30, %s2510_s9, %s2510_s9, %s2511_s27  }
 0x200   : > { %2023 = vst [vmem:[%s3016_s12 + $0x10] sm:$0xff] %v2005_v0  ;;  %s2031_s28 = scalar_lea.sflag [#allocation7], %s2930_s5  ;;  %s2449_s29 = sshra.s32 %s2063_s19, 4  ;;  %s2450_s29 = int_to_ptr.hbm [resolvable:$true] %s2449_s29 }
 0x201   : > { %s2451_s6 = scalar_lea.hbm %s2450_s29, 32  ;;  %s2455_s13 = scalar_lea.hbm %s3312_s4, 64 }
 0x202   : > { %p2452_p9 = scmp.ne.s32.totalorder %s2450_s29, %s2451_s6  ;;  %p2456_p12 = scmp.lt.s32.totalorder %s2450_s29, %s3312_s4 }
 0x203   : > { %p2457_p13 = scmp.lt.s32.totalorder %s2455_s13, %s2451_s6 }
 0x204   : > { %p2453_p10 = pnand %p2452_p9, %p2575_p5 }
 0x205   : > { %p2458_p0 = por %p2457_p13, %p2456_p12 }
 0x206   : > { %p2454_p11 = pneg %p2453_p10 }
 0x208   : > { %p2459_p1 = pnand %p2458_p0, %p2454_p11 }
 0x20a   : > { %2462 = shalt.err (!%p2459_p1)
}
 0x20b   : > { %2291 = dma.vmem_to_hbm [thread:$0]  (%p2575_p5), %s3263_s23, 512, %s2063_s19, %s2031_s28, %s2510_s9, %s2510_s9, %s2511_s27  }
 0x20c PF: > { %p2307_p2 = scmp.ge.s32.totalorder %s2505_s18, 2  ;;  %s2077_s5 = sand.u32 1, %s2493_s15  }
 0x20d   : > { %s2078_s12 = scalar_lea.sflag [#allocation4], %s2077_s5 }
 0x20e   : > { %p2299_p3 = pnand %p2307_p2, %p2579_p6 }
 0x210   : > { %p2300_p4 = pneg %p2299_p3 }
 0x212   : > { %2484 = dma.done.wait (%p2300_p4), %s2078_s12, 2048  }
 0x213   : > { %2486 = vsyncadd (%p2300_p4), %s2078_s12, 4294965248  ;;  %s2088_s7 = scalar_lea.sflag [#allocation7], %s2077_s5 }
 0x214   : > { %2488 = dma.done.wait (%p2300_p4), %s2088_s7, 512  }
 0x215   : > { %2490 = vsyncadd (%p2300_p4), %s2088_s7, 4294966784  ;;  %p19_p5 = scmp.ge.s32.totalorder %s2562_s21, 4   ;;  %s3315_s15 = smov %s2497_s16 }
 0x216   : > { %s3316_s16 = smov %s2501_s17  ;;  %s3317_s17 = smov %s2573_s24 }
 0x217   : > { %s3318_s18 = smov %s2562_s21  ;;  %21 = sbr.rel (!%p19_p5) target bundleno = 6 (0x6), region = 93 }
 0x21c   :  { %2094 = vsyncpa [#allocation3], 1 }
 0x21d   :  { %2096 = vsyncpa [#allocation3 + $0x1], 1 }
 0x21e   :  { %2097 = vsyncpa [#allocation4], 1 }
 0x21f   :  { %2099 = vsyncpa [#allocation4 + $0x1], 1 }
 0x220   :  { %2100 = vsyncpa [#allocation7], 1 }
 0x221   :  { %2102 = vsyncpa [#allocation7 + $0x1], 1 }

</bundles_post_ra>
